<compile_context>
chip_gen: v5e
topology: v5e:2x2
jax: 0.10.0
libtpu: 0.0.40
codegen_flags: <defaults>
</compile_context>

<pallas_src>
import functools

import jax
import jax.numpy as jnp
from jax.experimental import pallas as pl
from jax.experimental.pallas import tpu as pltpu

EPS = 1e-5
_LANE = 128
_VMEM_LIMIT = 32 * 1024 * 1024      # scoped VMEM request (safe on v5e/v6e/v7x)
_VMEM_BUDGET = 12 * 1024 * 1024     # streaming-buffer budget used to pick tiles


def _pad_to(n, m):
    return ((n + m - 1) // m) * m


def _cparams():
    return pltpu.CompilerParams(dimension_semantics=("parallel",),
                                vmem_limit_bytes=_VMEM_LIMIT)


def _choose_tm(m, stream_bytes_per_row, resident_bytes=0):
    """Largest M-tile (multiple of 8, capped at 256 rows) whose double-buffered
    streaming footprint fits the VMEM budget.  Real deployments would sweep
    256..1024 rows per chip generation (v7x has half the VMEM of v5e/v6e)."""
    budget = max(_VMEM_BUDGET - 2 * resident_bytes, 1 << 20)
    tm = min(256, _pad_to(max(m, 1), 8))
    while tm > 8 and 2 * tm * stream_bytes_per_row > budget:
        tm = _pad_to(tm // 2, 8)
    return tm


# ---------------------------------------------------------------------------
# Pallas kernels
# ---------------------------------------------------------------------------
def _partial_stats(y):
    """(1, 8, C) tile: row 0 = per-channel sum, row 1 = per-channel sum of sq."""
    c = y.shape[1]
    s1 = jnp.sum(y, axis=0, keepdims=True)            # (1, C)
    s2 = jnp.sum(y * y, axis=0, keepdims=True)        # (1, C)
    row = jax.lax.broadcasted_iota(jnp.int32, (8, c), 0)
    st = jnp.where(row == 0, s1, 0.0) + jnp.where(row == 1, s2, 0.0)
    return st[None, :, :]


def _mm_stats_kernel(p_ref, w_ref, y_ref, st_ref):
    """y = patches @ W (bf16 x bf16 -> f32) + per-tile partial BN statistics."""
    y = jnp.dot(p_ref[...], w_ref[...], preferred_element_type=jnp.float32)
    y_ref[...] = y
    st_ref[...] = _partial_stats(y)


def _mm2_stats_kernel(p_ref, w_ref, s_ref, ws_ref,
                      y_ref, ys_ref, st_ref, sts_ref):
    """conv2 + projection-shortcut 1x1 conv fused into one tile loop."""
    y = jnp.dot(p_ref[...], w_ref[...], preferred_element_type=jnp.float32)
    ys = jnp.dot(s_ref[...], ws_ref[...], preferred_element_type=jnp.float32)
    y_ref[...] = y
    ys_ref[...] = ys
    st_ref[...] = _partial_stats(y)
    sts_ref[...] = _partial_stats(ys)


def _bn_relu_kernel(y_ref, a_ref, b_ref, o_ref):
    """o = relu(a*y + b)  with per-channel a, b."""
    o = y_ref[...] * a_ref[...] + b_ref[...]
    o_ref[...] = jnp.maximum(o, 0.0).astype(o_ref.dtype)


def _bn_add_relu_kernel(y_ref, s_ref, a_ref, b_ref, as_ref, bs_ref, o_ref):
    """o = relu(a*y + b + as*s + bs)  (identity shortcut: as=1, bs=0, s=x)."""
    o = (y_ref[...] * a_ref[...] + b_ref[...]
         + s_ref[...].astype(jnp.float32) * as_ref[...] + bs_ref[...])
    o_ref[...] = jnp.maximum(o, 0.0).astype(o_ref.dtype)


# ---------------------------------------------------------------------------
# pallas_call wrappers
# ---------------------------------------------------------------------------
def _row_spec(tm, width):
    return pl.BlockSpec((tm, width), lambda i: (i, 0))


def _full_spec(shape):
    nd = len(shape)
    return pl.BlockSpec(shape, lambda i: (0,) * nd)


def _mm_stats(p, w, tm):
    m_pad, k_pad = p.shape
    cpad = w.shape[1]
    gm = m_pad // tm
    return pl.pallas_call(
        _mm_stats_kernel,
        out_shape=(jax.ShapeDtypeStruct((m_pad, cpad), jnp.float32),
                   jax.ShapeDtypeStruct((gm, 8, cpad), jnp.float32)),
        grid=(gm,),
        in_specs=[_row_spec(tm, k_pad), _full_spec((k_pad, cpad))],
        out_specs=(_row_spec(tm, cpad),
                   pl.BlockSpec((1, 8, cpad), lambda i: (i, 0, 0))),
        compiler_params=_cparams(),
    )(p, w)


def _mm2_stats(p, w, s, ws, tm):
    m_pad, k_pad = p.shape
    cpad = w.shape[1]
    ksp = s.shape[1]
    gm = m_pad // tm
    st_spec = pl.BlockSpec((1, 8, cpad), lambda i: (i, 0, 0))
    return pl.pallas_call(
        _mm2_stats_kernel,
        out_shape=(jax.ShapeDtypeStruct((m_pad, cpad), jnp.float32),
                   jax.ShapeDtypeStruct((m_pad, cpad), jnp.float32),
                   jax.ShapeDtypeStruct((gm, 8, cpad), jnp.float32),
                   jax.ShapeDtypeStruct((gm, 8, cpad), jnp.float32)),
        grid=(gm,),
        in_specs=[_row_spec(tm, k_pad), _full_spec((k_pad, cpad)),
                  _row_spec(tm, ksp), _full_spec((ksp, cpad))],
        out_specs=(_row_spec(tm, cpad), _row_spec(tm, cpad), st_spec, st_spec),
        compiler_params=_cparams(),
    )(p, w, s, ws)


def _bn_relu(y, a, b, tm, out_dtype):
    m_pad, cpad = y.shape
    gm = m_pad // tm
    vec = _full_spec((1, cpad))
    return pl.pallas_call(
        _bn_relu_kernel,
        out_shape=jax.ShapeDtypeStruct((m_pad, cpad), out_dtype),
        grid=(gm,),
        in_specs=[_row_spec(tm, cpad), vec, vec],
        out_specs=_row_spec(tm, cpad),
        compiler_params=_cparams(),
    )(y, a, b)


def _bn_add_relu(y, s, a, b, a_s, b_s, tm, out_dtype):
    m_pad, cpad = y.shape
    gm = m_pad // tm
    vec = _full_spec((1, cpad))
    return pl.pallas_call(
        _bn_add_relu_kernel,
        out_shape=jax.ShapeDtypeStruct((m_pad, cpad), out_dtype),
        grid=(gm,),
        in_specs=[_row_spec(tm, cpad), _row_spec(tm, cpad), vec, vec, vec, vec],
        out_specs=_row_spec(tm, cpad),
        compiler_params=_cparams(),
    )(y, s, a, b, a_s, b_s)


# ---------------------------------------------------------------------------
# Plain-JAX glue: im2col, padding, BN coefficient reduction, parameter init
# ---------------------------------------------------------------------------
def _im2col_3x3(x, stride):
    """x: (N, H, W, C) -> (N*Ho*Wo, 9*C) patches, column order (kh, kw, c)."""
    n, h, w, c = x.shape
    xp = jnp.pad(x, ((0, 0), (1, 1), (1, 1), (0, 0)))
    ho = (h + 2 - 3) // stride + 1
    wo = (w + 2 - 3) // stride + 1
    cols = []
    for kh in range(3):
        for kw in range(3):
            sl = xp[:, kh:kh + (ho - 1) * stride + 1:stride,
                       kw:kw + (wo - 1) * stride + 1:stride, :]
            cols.append(sl)
    patches = jnp.concatenate(cols, axis=-1)           # (N, Ho, Wo, 9*C)
    return patches.reshape(n * ho * wo, 9 * c), ho, wo


def _pad2d(a, rows, cols):
    r, c = a.shape
    return jnp.pad(a, ((0, rows - r), (0, cols - c)))


def _bn_coeffs(stats, m, gamma, beta, cpad):
    """Reduce per-tile partial sums -> per-channel (scale, bias) for BN."""
    g = jnp.zeros((cpad,), jnp.float32).at[:gamma.shape[0]].set(gamma)
    be = jnp.zeros((cpad,), jnp.float32).at[:beta.shape[0]].set(beta)
    ssum = jnp.sum(stats[:, 0, :], axis=0)
    ssq = jnp.sum(stats[:, 1, :], axis=0)
    mean = ssum / m
    var = jnp.maximum(ssq / m - mean * mean, 0.0)
    a = g * jax.lax.rsqrt(var + EPS)
    b = be - mean * a
    return a.reshape(1, cpad), b.reshape(1, cpad)


def init_basic_block_params(key, in_planes, planes, stride):
    """Deterministic synthetic parameters matching the PyTorch __init__ shapes."""
    k1, k2, k3 = jax.random.split(key, 3)
    params = {
        "conv1_w": 0.1 * jax.random.normal(k1, (planes, in_planes, 3, 3), jnp.float32),
        "bn1_gamma": jnp.ones((planes,), jnp.float32),
        "bn1_beta": jnp.zeros((planes,), jnp.float32),
        "conv2_w": 0.1 * jax.random.normal(k2, (planes, planes, 3, 3), jnp.float32),
        "bn2_gamma": jnp.ones((planes,), jnp.float32),
        "bn2_beta": jnp.zeros((planes,), jnp.float32),
    }
    if stride != 1 or in_planes != planes:
        params["sc_w"] = 0.1 * jax.random.normal(k3, (planes, in_planes, 1, 1), jnp.float32)
        params["sc_gamma"] = jnp.ones((planes,), jnp.float32)
        params["sc_beta"] = jnp.zeros((planes,), jnp.float32)
    return params


# ---------------------------------------------------------------------------
# Forward pass
# ---------------------------------------------------------------------------
def basic_block_forward(x_nchw, params, stride):
    """BasicBlock forward.  x_nchw: (N, C_in, H, W) -> (N, planes, Ho, Wo)."""
    x = jnp.transpose(x_nchw, (0, 2, 3, 1)).astype(jnp.float32)   # NCHW -> NHWC
    n, h, w, cin = x.shape
    planes = params["conv1_w"].shape[0]
    cpad = _pad_to(planes, _LANE)
    has_proj = "sc_w" in params

    x_bf = x.astype(jnp.bfloat16)   # bf16 MXU operands, f32 accumulation

    # ---------------- conv1 -> bn1 -> relu ----------------
    p1, ho, wo = _im2col_3x3(x_bf, stride)                        # (M, 9*cin) bf16
    m = n * ho * wo
    k1p = _pad_to(9 * cin, _LANE)
    tm1 = _choose_tm(m, k1p * 2 + cpad * 4, resident_bytes=k1p * cpad * 2)
    m1p = _pad_to(m, tm1)
    p1 = _pad2d(p1, m1p, k1p)
    w1 = jnp.transpose(params["conv1_w"], (2, 3, 1, 0)).reshape(9 * cin, planes)
    w1 = _pad2d(w1.astype(jnp.bfloat16), k1p, cpad)

    y1, st1 = _mm_stats(p1, w1, tm1)
    a1, b1 = _bn_coeffs(st1, m, params["bn1_gamma"], params["bn1_beta"], cpad)
    out1 = _bn_relu(y1, a1, b1, tm1, jnp.bfloat16)                # (m1p, cpad) bf16
    out1 = out1[:m, :planes].reshape(n, ho, wo, planes)

    # ---------------- conv2 -> bn2 (+ shortcut) -> relu ----------------
    p2, _, _ = _im2col_3x3(out1, 1)                               # (M, 9*planes) bf16
    k2p = _pad_to(9 * planes, _LANE)
    w2 = jnp.transpose(params["conv2_w"], (2, 3, 1, 0)).reshape(9 * planes, planes)
    w2 = _pad2d(w2.astype(jnp.bfloat16), k2p, cpad)

    if has_proj:
        ksp = _pad_to(cin, _LANE)
        tm2 = _choose_tm(m, (k2p + ksp) * 2 + 2 * cpad * 4,
                         resident_bytes=(k2p + ksp) * cpad * 2)
        m2p = _pad_to(m, tm2)
        p2 = _pad2d(p2, m2p, k2p)
        sc = x_bf[:, 0:(ho - 1) * stride + 1:stride,
                     0:(wo - 1) * stride + 1:stride, :].reshape(m, cin)
        sc = _pad2d(sc, m2p, ksp)
        ws = _pad2d(params["sc_w"].reshape(planes, cin).T.astype(jnp.bfloat16),
                    ksp, cpad)
        y2, ys, st2, sts = _mm2_stats(p2, w2, sc, ws, tm2)
        a2, b2 = _bn_coeffs(st2, m, params["bn2_gamma"], params["bn2_beta"], cpad)
        a_s, b_s = _bn_coeffs(sts, m, params["sc_gamma"], params["sc_beta"], cpad)
        out = _bn_add_relu(y2, ys, a2, b2, a_s, b_s, tm2, jnp.float32)
    else:
        tm2 = _choose_tm(m, k2p * 2 + 2 * cpad * 4, resident_bytes=k2p * cpad * 2)
        m2p = _pad_to(m, tm2)
        p2 = _pad2d(p2, m2p, k2p)
        # identity shortcut: add the original (f32) input with scale 1 / bias 0
        s_id = _pad2d(x.reshape(m, cin), m2p, cpad)
        y2, st2 = _mm_stats(p2, w2, tm2)
        a2, b2 = _bn_coeffs(st2, m, params["bn2_gamma"], params["bn2_beta"], cpad)
        ones = jnp.ones((1, cpad), jnp.float32)
        zeros = jnp.zeros((1, cpad), jnp.float32)
        out = _bn_add_relu(y2, s_id, a2, b2, ones, zeros, tm2, jnp.float32)

    out = out[:m, :planes].reshape(n, ho, wo, planes)
    return jnp.transpose(out, (0, 3, 1, 2))                       # NHWC -> NCHW


# ---------------------------------------------------------------------------
# Independent reference (lax.conv path).  MXU operands are rounded to bf16
# exactly like the Pallas kernels (f32 everywhere else) so the comparison
# tolerance stays tight while the math path stays independent.
# ---------------------------------------------------------------------------
def ref_basic_block(x_nchw, params, stride):
    f32 = jnp.float32

    def q(a):  # bf16 operand rounding used by the kernels
        return a.astype(jnp.bfloat16).astype(f32)

    x = jnp.transpose(x_nchw, (0, 2, 3, 1)).astype(f32)

    def conv(inp, w_oihw, s, pad):
        return jax.lax.conv_general_dilated(
            inp, w_oihw, window_strides=(s, s), padding=pad,
            dimension_numbers=("NHWC", "OIHW", "NHWC"))

    def bn(y, g, b):
        mean = jnp.mean(y, axis=(0, 1, 2), keepdims=True)
        var = jnp.mean(jnp.square(y - mean), axis=(0, 1, 2), keepdims=True)
        return (y - mean) * jax.lax.rsqrt(var + EPS) * g.reshape(1, 1, 1, -1) \
               + b.reshape(1, 1, 1, -1)

    xq = q(x)
    out1 = jnp.maximum(bn(conv(xq, q(params["conv1_w"]), stride, ((1, 1), (1, 1))),
                          params["bn1_gamma"], params["bn1_beta"]), 0.0)
    out1 = q(out1)   # kernels store the conv1 activation in bf16
    out = bn(conv(out1, q(params["conv2_w"]), 1, ((1, 1), (1, 1))),
             params["bn2_gamma"], params["bn2_beta"])
    if "sc_w" in params:
        sc = bn(conv(xq, q(params["sc_w"]), stride, ((0, 0), (0, 0))),
                params["sc_gamma"], params["sc_beta"])
    else:
        sc = x
    out = jnp.maximum(out + sc, 0.0)
    return jnp.transpose(out, (0, 3, 1, 2))


# ---------------------------------------------------------------------------
if __name__ == "__main__":
    key = jax.random.PRNGKey(0)
    kx1, kx2, kp1, kp2 = jax.random.split(key, 4)

    # Config 1: projection shortcut (in_planes=4 -> planes=8, stride=2)
    x1 = jax.random.normal(kx1, (2, 4, 16, 16), jnp.float32)
    params1 = init_basic_block_params(kp1, in_planes=4, planes=8, stride=2)
    fwd1 = jax.jit(functools.partial(basic_block_forward, stride=2))
    y1 = fwd1(x1, params1)
    jax.block_until_ready(y1)
    r1 = ref_basic_block(x1, params1, 2)
    assert y1.shape == (2, 8, 8, 8), y1.shape
    err1 = float(jnp.max(jnp.abs(y1 - r1)))
    assert err1 < 5e-3, err1

    # Config 2: identity shortcut (in_planes=planes=8, stride=1).
    # M = 512 with TM = 256 -> exercises the multi-tile (grid_m = 2) path,
    # including the cross-tile BatchNorm statistics reduction.
    x2 = jax.random.normal(kx2, (2, 8, 16, 16), jnp.float32)
    params2 = init_basic_block_params(kp2, in_planes=8, planes=8, stride=1)
    fwd2 = jax.jit(functools.partial(basic_block_forward, stride=1))
    y2 = fwd2(x2, params2)
    jax.block_until_ready(y2)
    r2 = ref_basic_block(x2, params2, 1)
    assert y2.shape == (2, 8, 16, 16), y2.shape
    err2 = float(jnp.max(jnp.abs(y2 - r2)))
    assert err2 < 5e-3, err2

    print("KERNEL_OK")
</pallas_src>

<mosaic_0001>
module attributes {stable_mosaic.version = 11 : i64} {
  func.func @_bn_relu_kernel(%arg0: i32, %arg1: memref<128x128xf32, #tpu.memory_space<vmem>>, %arg2: memref<1x128xf32, #tpu.memory_space<vmem>>, %arg3: memref<1x128xf32, #tpu.memory_space<vmem>>, %arg4: memref<128x128xbf16, #tpu.memory_space<vmem>>) attributes {dimension_semantics = [#tpu.dimension_semantics<parallel>], iteration_bounds = array<i64: 1>, scalar_prefetch = 0 : i64, scratch_operands = 0 : i64, tpu.core_type = #tpu.core_type<tc>, window_params = [{transform_indices = @transform_0, window_bounds = array<i64: 128, 128>}, {pipeline_mode = #tpu.pipeline_mode<synchronous>, transform_indices = @transform_1, window_bounds = array<i64: 1, 128>}, {pipeline_mode = #tpu.pipeline_mode<synchronous>, transform_indices = @transform_2, window_bounds = array<i64: 1, 128>}, {transform_indices = @transform_3, window_bounds = array<i64: 128, 128>}]} {
    %c0 = arith.constant 0 : index
    %c0_0 = arith.constant 0 : index
    %0 = vector.load %arg1[%c0, %c0_0] : memref<128x128xf32, #tpu.memory_space<vmem>>, vector<128x128xf32>
    %c0_1 = arith.constant 0 : index
    %c0_2 = arith.constant 0 : index
    %1 = vector.load %arg2[%c0_1, %c0_2] : memref<1x128xf32, #tpu.memory_space<vmem>>, vector<1x128xf32>
    %2 = vector.broadcast %1 : vector<1x128xf32> to vector<128x128xf32>
    %3 = arith.mulf %0, %2 : vector<128x128xf32>
    %c0_3 = arith.constant 0 : index
    %c0_4 = arith.constant 0 : index
    %4 = vector.load %arg3[%c0_3, %c0_4] : memref<1x128xf32, #tpu.memory_space<vmem>>, vector<1x128xf32>
    %5 = vector.broadcast %4 : vector<1x128xf32> to vector<128x128xf32>
    %6 = arith.addf %3, %5 : vector<128x128xf32>
    %cst = arith.constant 0.000000e+00 : f32
    %7 = vector.broadcast %cst : f32 to vector<128x128xf32>
    %8 = arith.maximumf %6, %7 : vector<128x128xf32>
    %9 = arith.truncf %8 : vector<128x128xf32> to vector<128x128xbf16>
    %c0_5 = arith.constant 0 : index
    %c0_6 = arith.constant 0 : index
    %10 = vector.load %arg4[%c0_5, %c0_6] : memref<128x128xbf16, #tpu.memory_space<vmem>>, vector<128x128xbf16>
    tpu.vector_store %arg4[%c0_5, %c0_6], %9 {strides = array<i32>} : memref<128x128xbf16, #tpu.memory_space<vmem>>, vector<128x128xbf16>,
    return
  }
  func.func @transform_0(%arg0: i32) -> (i32, i32) {
    %c0_i32 = arith.constant 0 : i32
    %c0_i32_0 = arith.constant 0 : i32
    return %arg0, %c0_i32 : i32, i32
  }
  func.func @transform_1(%arg0: i32) -> (i32, i32) {
    %c0_i32 = arith.constant 0 : i32
    %c0_i32_0 = arith.constant 0 : i32
    %c0_i32_1 = arith.constant 0 : i32
    return %c0_i32, %c0_i32_0 : i32, i32
  }
  func.func @transform_2(%arg0: i32) -> (i32, i32) {
    %c0_i32 = arith.constant 0 : i32
    %c0_i32_0 = arith.constant 0 : i32
    %c0_i32_1 = arith.constant 0 : i32
    return %c0_i32, %c0_i32_0 : i32, i32
  }
  func.func @transform_3(%arg0: i32) -> (i32, i32) {
    %c0_i32 = arith.constant 0 : i32
    %c0_i32_0 = arith.constant 0 : i32
    return %arg0, %c0_i32 : i32, i32
  }
}

module attributes {stable_mosaic.version = 11 : i64} {
  func.func @_mm_stats_kernel(%arg0: i32, %arg1: memref<128x128xbf16, #tpu.memory_space<vmem>>, %arg2: memref<128x128xbf16, #tpu.memory_space<vmem>>, %arg3: memref<128x128xf32, #tpu.memory_space<vmem>>, %arg4: memref<1x8x128xf32, #tpu.memory_space<vmem>>) attributes {dimension_semantics = [#tpu.dimension_semantics<parallel>], iteration_bounds = array<i64: 1>, scalar_prefetch = 0 : i64, scratch_operands = 0 : i64, tpu.core_type = #tpu.core_type<tc>, window_params = [{transform_indices = @transform_0, window_bounds = array<i64: 128, 128>}, {pipeline_mode = #tpu.pipeline_mode<synchronous>, transform_indices = @transform_1, window_bounds = array<i64: 128, 128>}, {transform_indices = @transform_2, window_bounds = array<i64: 128, 128>}, {transform_indices = @transform_3, window_bounds = array<i64: 1, 8, 128>}]} {
    %c0 = arith.constant 0 : index
    %c0_0 = arith.constant 0 : index
    %0 = vector.load %arg1[%c0, %c0_0] : memref<128x128xbf16, #tpu.memory_space<vmem>>, vector<128x128xbf16>
    %c0_1 = arith.constant 0 : index
    %c0_2 = arith.constant 0 : index
    %1 = vector.load %arg2[%c0_1, %c0_2] : memref<128x128xbf16, #tpu.memory_space<vmem>>, vector<128x128xbf16>
    %cst = arith.constant dense<0.000000e+00> : vector<128x128xf32>
    %2 = tpu.matmul %0, %1, %cst {dimension_numbers = #tpu.dot_dimension_numbers<[1], [0], [0], [1], [0, 0, 1, 1], [], []>} : vector<128x128xbf16>, vector<128x128xbf16>, vector<128x128xf32> -> vector<128x128xf32>
    %c0_3 = arith.constant 0 : index
    %c0_4 = arith.constant 0 : index
    %3 = vector.load %arg3[%c0_3, %c0_4] : memref<128x128xf32, #tpu.memory_space<vmem>>, vector<128x128xf32>
    tpu.vector_store %arg3[%c0_3, %c0_4], %2 {strides = array<i32>} : memref<128x128xf32, #tpu.memory_space<vmem>>, vector<128x128xf32>,
    %cst_5 = arith.constant dense<0.000000e+00> : vector<128xf32>
    %4 = vector.multi_reduction <add>, %2, %cst_5 [0] : vector<128x128xf32> to vector<128xf32>
    %5 = vector.shape_cast %4 : vector<128xf32> to vector<1x128xf32>
    %6 = arith.mulf %2, %2 : vector<128x128xf32>
    %cst_6 = arith.constant dense<0.000000e+00> : vector<128xf32>
    %7 = vector.multi_reduction <add>, %6, %cst_6 [0] : vector<128x128xf32> to vector<128xf32>
    %8 = vector.shape_cast %7 : vector<128xf32> to vector<1x128xf32>
    %9 = tpu.iota {dimensions = array<i32: 0>} : vector<8x128xi32>
    %c0_i32 = arith.constant 0 : i32
    %10 = vector.broadcast %c0_i32 : i32 to vector<8x128xi32>
    %11 = arith.cmpi eq, %9, %10 : vector<8x128xi32>
    %cst_7 = arith.constant 0.000000e+00 : f32
    %12 = vector.shape_cast %5 : vector<1x128xf32> to vector<1x128xf32>
    %13 = vector.broadcast %12 : vector<1x128xf32> to vector<8x128xf32>
    %14 = vector.broadcast %cst_7 : f32 to vector<8x128xf32>
    %15 = arith.select %11, %13, %14 : vector<8x128xi1>, vector<8x128xf32>
    %c1_i32 = arith.constant 1 : i32
    %16 = vector.broadcast %c1_i32 : i32 to vector<8x128xi32>
    %17 = arith.cmpi eq, %9, %16 : vector<8x128xi32>
    %cst_8 = arith.constant 0.000000e+00 : f32
    %18 = vector.shape_cast %8 : vector<1x128xf32> to vector<1x128xf32>
    %19 = vector.broadcast %18 : vector<1x128xf32> to vector<8x128xf32>
    %20 = vector.broadcast %cst_8 : f32 to vector<8x128xf32>
    %21 = arith.select %17, %19, %20 : vector<8x128xi1>, vector<8x128xf32>
    %22 = arith.addf %15, %21 : vector<8x128xf32>
    %23 = vector.shape_cast %22 : vector<8x128xf32> to vector<1x8x128xf32>
    %c0_9 = arith.constant 0 : index
    %c0_10 = arith.constant 0 : index
    %c0_11 = arith.constant 0 : index
    %24 = vector.load %arg4[%c0_9, %c0_10, %c0_11] : memref<1x8x128xf32, #tpu.memory_space<vmem>>, vector<1x8x128xf32>
    tpu.vector_store %arg4[%c0_9, %c0_10, %c0_11], %23 {strides = array<i32>} : memref<1x8x128xf32, #tpu.memory_space<vmem>>, vector<1x8x128xf32>,
    return
  }
  func.func @transform_0(%arg0: i32) -> (i32, i32) {
    %c0_i32 = arith.constant 0 : i32
    %c0_i32_0 = arith.constant 0 : i32
    return %arg0, %c0_i32 : i32, i32
  }
  func.func @transform_1(%arg0: i32) -> (i32, i32) {
    %c0_i32 = arith.constant 0 : i32
    %c0_i32_0 = arith.constant 0 : i32
    %c0_i32_1 = arith.constant 0 : i32
    return %c0_i32, %c0_i32_0 : i32, i32
  }
  func.func @transform_2(%arg0: i32) -> (i32, i32) {
    %c0_i32 = arith.constant 0 : i32
    %c0_i32_0 = arith.constant 0 : i32
    return %arg0, %c0_i32 : i32, i32
  }
  func.func @transform_3(%arg0: i32) -> (i32, i32, i32) {
    %c0_i32 = arith.constant 0 : i32
    %c0_i32_0 = arith.constant 0 : i32
    %c0_i32_1 = arith.constant 0 : i32
    return %arg0, %c0_i32, %c0_i32_0 : i32, i32, i32
  }
}

module attributes {stable_mosaic.version = 11 : i64} {
  func.func @_bn_add_relu_kernel(%arg0: i32, %arg1: memref<128x128xf32, #tpu.memory_space<vmem>>, %arg2: memref<128x128xf32, #tpu.memory_space<vmem>>, %arg3: memref<1x128xf32, #tpu.memory_space<vmem>>, %arg4: memref<1x128xf32, #tpu.memory_space<vmem>>, %arg5: memref<1x128xf32, #tpu.memory_space<vmem>>, %arg6: memref<1x128xf32, #tpu.memory_space<vmem>>, %arg7: memref<128x128xf32, #tpu.memory_space<vmem>>) attributes {dimension_semantics = [#tpu.dimension_semantics<parallel>], iteration_bounds = array<i64: 1>, scalar_prefetch = 0 : i64, scratch_operands = 0 : i64, tpu.core_type = #tpu.core_type<tc>, window_params = [{transform_indices = @transform_0, window_bounds = array<i64: 128, 128>}, {transform_indices = @transform_1, window_bounds = array<i64: 128, 128>}, {pipeline_mode = #tpu.pipeline_mode<synchronous>, transform_indices = @transform_2, window_bounds = array<i64: 1, 128>}, {pipeline_mode = #tpu.pipeline_mode<synchronous>, transform_indices = @transform_3, window_bounds = array<i64: 1, 128>}, {pipeline_mode = #tpu.pipeline_mode<synchronous>, transform_indices = @transform_4, window_bounds = array<i64: 1, 128>}, {pipeline_mode = #tpu.pipeline_mode<synchronous>, transform_indices = @transform_5, window_bounds = array<i64: 1, 128>}, {transform_indices = @transform_6, window_bounds = array<i64: 128, 128>}]} {
    %c0 = arith.constant 0 : index
    %c0_0 = arith.constant 0 : index
    %0 = vector.load %arg1[%c0, %c0_0] : memref<128x128xf32, #tpu.memory_space<vmem>>, vector<128x128xf32>
    %c0_1 = arith.constant 0 : index
    %c0_2 = arith.constant 0 : index
    %1 = vector.load %arg3[%c0_1, %c0_2] : memref<1x128xf32, #tpu.memory_space<vmem>>, vector<1x128xf32>
    %2 = vector.broadcast %1 : vector<1x128xf32> to vector<128x128xf32>
    %3 = arith.mulf %0, %2 : vector<128x128xf32>
    %c0_3 = arith.constant 0 : index
    %c0_4 = arith.constant 0 : index
    %4 = vector.load %arg4[%c0_3, %c0_4] : memref<1x128xf32, #tpu.memory_space<vmem>>, vector<1x128xf32>
    %5 = vector.broadcast %4 : vector<1x128xf32> to vector<128x128xf32>
    %6 = arith.addf %3, %5 : vector<128x128xf32>
    %c0_5 = arith.constant 0 : index
    %c0_6 = arith.constant 0 : index
    %7 = vector.load %arg2[%c0_5, %c0_6] : memref<128x128xf32, #tpu.memory_space<vmem>>, vector<128x128xf32>
    %c0_7 = arith.constant 0 : index
    %c0_8 = arith.constant 0 : index
    %8 = vector.load %arg5[%c0_7, %c0_8] : memref<1x128xf32, #tpu.memory_space<vmem>>, vector<1x128xf32>
    %9 = vector.broadcast %8 : vector<1x128xf32> to vector<128x128xf32>
    %10 = arith.mulf %7, %9 : vector<128x128xf32>
    %11 = arith.addf %6, %10 : vector<128x128xf32>
    %c0_9 = arith.constant 0 : index
    %c0_10 = arith.constant 0 : index
    %12 = vector.load %arg6[%c0_9, %c0_10] : memref<1x128xf32, #tpu.memory_space<vmem>>, vector<1x128xf32>
    %13 = vector.broadcast %12 : vector<1x128xf32> to vector<128x128xf32>
    %14 = arith.addf %11, %13 : vector<128x128xf32>
    %cst = arith.constant 0.000000e+00 : f32
    %15 = vector.broadcast %cst : f32 to vector<128x128xf32>
    %16 = arith.maximumf %14, %15 : vector<128x128xf32>
    %c0_11 = arith.constant 0 : index
    %c0_12 = arith.constant 0 : index
    %17 = vector.load %arg7[%c0_11, %c0_12] : memref<128x128xf32, #tpu.memory_space<vmem>>, vector<128x128xf32>
    tpu.vector_store %arg7[%c0_11, %c0_12], %16 {strides = array<i32>} : memref<128x128xf32, #tpu.memory_space<vmem>>, vector<128x128xf32>,
    return
  }
  func.func @transform_0(%arg0: i32) -> (i32, i32) {
    %c0_i32 = arith.constant 0 : i32
    %c0_i32_0 = arith.constant 0 : i32
    return %arg0, %c0_i32 : i32, i32
  }
  func.func @transform_1(%arg0: i32) -> (i32, i32) {
    %c0_i32 = arith.constant 0 : i32
    %c0_i32_0 = arith.constant 0 : i32
    return %arg0, %c0_i32 : i32, i32
  }
  func.func @transform_2(%arg0: i32) -> (i32, i32) {
    %c0_i32 = arith.constant 0 : i32
    %c0_i32_0 = arith.constant 0 : i32
    %c0_i32_1 = arith.constant 0 : i32
    return %c0_i32, %c0_i32_0 : i32, i32
  }
  func.func @transform_3(%arg0: i32) -> (i32, i32) {
    %c0_i32 = arith.constant 0 : i32
    %c0_i32_0 = arith.constant 0 : i32
    %c0_i32_1 = arith.constant 0 : i32
    return %c0_i32, %c0_i32_0 : i32, i32
  }
  func.func @transform_4(%arg0: i32) -> (i32, i32) {
    %c0_i32 = arith.constant 0 : i32
    %c0_i32_0 = arith.constant 0 : i32
    %c0_i32_1 = arith.constant 0 : i32
    return %c0_i32, %c0_i32_0 : i32, i32
  }
  func.func @transform_5(%arg0: i32) -> (i32, i32) {
    %c0_i32 = arith.constant 0 : i32
    %c0_i32_0 = arith.constant 0 : i32
    %c0_i32_1 = arith.constant 0 : i32
    return %c0_i32, %c0_i32_0 : i32, i32
  }
  func.func @transform_6(%arg0: i32) -> (i32, i32) {
    %c0_i32 = arith.constant 0 : i32
    %c0_i32_0 = arith.constant 0 : i32
    return %arg0, %c0_i32 : i32, i32
  }
}

module attributes {stable_mosaic.version = 11 : i64} {
  func.func @_mm2_stats_kernel(%arg0: i32, %arg1: memref<128x128xbf16, #tpu.memory_space<vmem>>, %arg2: memref<128x128xbf16, #tpu.memory_space<vmem>>, %arg3: memref<128x128xbf16, #tpu.memory_space<vmem>>, %arg4: memref<128x128xbf16, #tpu.memory_space<vmem>>, %arg5: memref<128x128xf32, #tpu.memory_space<vmem>>, %arg6: memref<128x128xf32, #tpu.memory_space<vmem>>, %arg7: memref<1x8x128xf32, #tpu.memory_space<vmem>>, %arg8: memref<1x8x128xf32, #tpu.memory_space<vmem>>) attributes {dimension_semantics = [#tpu.dimension_semantics<parallel>], iteration_bounds = array<i64: 1>, scalar_prefetch = 0 : i64, scratch_operands = 0 : i64, tpu.core_type = #tpu.core_type<tc>, window_params = [{transform_indices = @transform_0, window_bounds = array<i64: 128, 128>}, {pipeline_mode = #tpu.pipeline_mode<synchronous>, transform_indices = @transform_1, window_bounds = array<i64: 128, 128>}, {transform_indices = @transform_2, window_bounds = array<i64: 128, 128>}, {pipeline_mode = #tpu.pipeline_mode<synchronous>, transform_indices = @transform_3, window_bounds = array<i64: 128, 128>}, {transform_indices = @transform_4, window_bounds = array<i64: 128, 128>}, {transform_indices = @transform_5, window_bounds = array<i64: 128, 128>}, {transform_indices = @transform_6, window_bounds = array<i64: 1, 8, 128>}, {transform_indices = @transform_7, window_bounds = array<i64: 1, 8, 128>}]} {
    %c0 = arith.constant 0 : index
    %c0_0 = arith.constant 0 : index
    %0 = vector.load %arg1[%c0, %c0_0] : memref<128x128xbf16, #tpu.memory_space<vmem>>, vector<128x128xbf16>
    %c0_1 = arith.constant 0 : index
    %c0_2 = arith.constant 0 : index
    %1 = vector.load %arg2[%c0_1, %c0_2] : memref<128x128xbf16, #tpu.memory_space<vmem>>, vector<128x128xbf16>
    %cst = arith.constant dense<0.000000e+00> : vector<128x128xf32>
    %2 = tpu.matmul %0, %1, %cst {dimension_numbers = #tpu.dot_dimension_numbers<[1], [0], [0], [1], [0, 0, 1, 1], [], []>} : vector<128x128xbf16>, vector<128x128xbf16>, vector<128x128xf32> -> vector<128x128xf32>
    %c0_3 = arith.constant 0 : index
    %c0_4 = arith.constant 0 : index
    %3 = vector.load %arg3[%c0_3, %c0_4] : memref<128x128xbf16, #tpu.memory_space<vmem>>, vector<128x128xbf16>
    %c0_5 = arith.constant 0 : index
    %c0_6 = arith.constant 0 : index
    %4 = vector.load %arg4[%c0_5, %c0_6] : memref<128x128xbf16, #tpu.memory_space<vmem>>, vector<128x128xbf16>
    %cst_7 = arith.constant dense<0.000000e+00> : vector<128x128xf32>
    %5 = tpu.matmul %3, %4, %cst_7 {dimension_numbers = #tpu.dot_dimension_numbers<[1], [0], [0], [1], [0, 0, 1, 1], [], []>} : vector<128x128xbf16>, vector<128x128xbf16>, vector<128x128xf32> -> vector<128x128xf32>
    %c0_8 = arith.constant 0 : index
    %c0_9 = arith.constant 0 : index
    %6 = vector.load %arg5[%c0_8, %c0_9] : memref<128x128xf32, #tpu.memory_space<vmem>>, vector<128x128xf32>
    tpu.vector_store %arg5[%c0_8, %c0_9], %2 {strides = array<i32>} : memref<128x128xf32, #tpu.memory_space<vmem>>, vector<128x128xf32>,
    %c0_10 = arith.constant 0 : index
    %c0_11 = arith.constant 0 : index
    %7 = vector.load %arg6[%c0_10, %c0_11] : memref<128x128xf32, #tpu.memory_space<vmem>>, vector<128x128xf32>
    tpu.vector_store %arg6[%c0_10, %c0_11], %5 {strides = array<i32>} : memref<128x128xf32, #tpu.memory_space<vmem>>, vector<128x128xf32>,
    %cst_12 = arith.constant dense<0.000000e+00> : vector<128xf32>
    %8 = vector.multi_reduction <add>, %2, %cst_12 [0] : vector<128x128xf32> to vector<128xf32>
    %9 = vector.shape_cast %8 : vector<128xf32> to vector<1x128xf32>
    %10 = arith.mulf %2, %2 : vector<128x128xf32>
    %cst_13 = arith.constant dense<0.000000e+00> : vector<128xf32>
    %11 = vector.multi_reduction <add>, %10, %cst_13 [0] : vector<128x128xf32> to vector<128xf32>
    %12 = vector.shape_cast %11 : vector<128xf32> to vector<1x128xf32>
    %13 = tpu.iota {dimensions = array<i32: 0>} : vector<8x128xi32>
    %c0_i32 = arith.constant 0 : i32
    %14 = vector.broadcast %c0_i32 : i32 to vector<8x128xi32>
    %15 = arith.cmpi eq, %13, %14 : vector<8x128xi32>
    %cst_14 = arith.constant 0.000000e+00 : f32
    %16 = vector.shape_cast %9 : vector<1x128xf32> to vector<1x128xf32>
    %17 = vector.broadcast %16 : vector<1x128xf32> to vector<8x128xf32>
    %18 = vector.broadcast %cst_14 : f32 to vector<8x128xf32>
    %19 = arith.select %15, %17, %18 : vector<8x128xi1>, vector<8x128xf32>
    %c1_i32 = arith.constant 1 : i32
    %20 = vector.broadcast %c1_i32 : i32 to vector<8x128xi32>
    %21 = arith.cmpi eq, %13, %20 : vector<8x128xi32>
    %cst_15 = arith.constant 0.000000e+00 : f32
    %22 = vector.shape_cast %12 : vector<1x128xf32> to vector<1x128xf32>
    %23 = vector.broadcast %22 : vector<1x128xf32> to vector<8x128xf32>
    %24 = vector.broadcast %cst_15 : f32 to vector<8x128xf32>
    %25 = arith.select %21, %23, %24 : vector<8x128xi1>, vector<8x128xf32>
    %26 = arith.addf %19, %25 : vector<8x128xf32>
    %27 = vector.shape_cast %26 : vector<8x128xf32> to vector<1x8x128xf32>
    %c0_16 = arith.constant 0 : index
    %c0_17 = arith.constant 0 : index
    %c0_18 = arith.constant 0 : index
    %28 = vector.load %arg7[%c0_16, %c0_17, %c0_18] : memref<1x8x128xf32, #tpu.memory_space<vmem>>, vector<1x8x128xf32>
    tpu.vector_store %arg7[%c0_16, %c0_17, %c0_18], %27 {strides = array<i32>} : memref<1x8x128xf32, #tpu.memory_space<vmem>>, vector<1x8x128xf32>,
    %cst_19 = arith.constant dense<0.000000e+00> : vector<128xf32>
    %29 = vector.multi_reduction <add>, %5, %cst_19 [0] : vector<128x128xf32> to vector<128xf32>
    %30 = vector.shape_cast %29 : vector<128xf32> to vector<1x128xf32>
    %31 = arith.mulf %5, %5 : vector<128x128xf32>
    %cst_20 = arith.constant dense<0.000000e+00> : vector<128xf32>
    %32 = vector.multi_reduction <add>, %31, %cst_20 [0] : vector<128x128xf32> to vector<128xf32>
    %33 = vector.shape_cast %32 : vector<128xf32> to vector<1x128xf32>
    %34 = tpu.iota {dimensions = array<i32: 0>} : vector<8x128xi32>
    %c0_i32_21 = arith.constant 0 : i32
    %35 = vector.broadcast %c0_i32_21 : i32 to vector<8x128xi32>
    %36 = arith.cmpi eq, %34, %35 : vector<8x128xi32>
    %cst_22 = arith.constant 0.000000e+00 : f32
    %37 = vector.shape_cast %30 : vector<1x128xf32> to vector<1x128xf32>
    %38 = vector.broadcast %37 : vector<1x128xf32> to vector<8x128xf32>
    %39 = vector.broadcast %cst_22 : f32 to vector<8x128xf32>
    %40 = arith.select %36, %38, %39 : vector<8x128xi1>, vector<8x128xf32>
    %c1_i32_23 = arith.constant 1 : i32
    %41 = vector.broadcast %c1_i32_23 : i32 to vector<8x128xi32>
    %42 = arith.cmpi eq, %34, %41 : vector<8x128xi32>
    %cst_24 = arith.constant 0.000000e+00 : f32
    %43 = vector.shape_cast %33 : vector<1x128xf32> to vector<1x128xf32>
    %44 = vector.broadcast %43 : vector<1x128xf32> to vector<8x128xf32>
    %45 = vector.broadcast %cst_24 : f32 to vector<8x128xf32>
    %46 = arith.select %42, %44, %45 : vector<8x128xi1>, vector<8x128xf32>
    %47 = arith.addf %40, %46 : vector<8x128xf32>
    %48 = vector.shape_cast %47 : vector<8x128xf32> to vector<1x8x128xf32>
    %c0_25 = arith.constant 0 : index
    %c0_26 = arith.constant 0 : index
    %c0_27 = arith.constant 0 : index
    %49 = vector.load %arg8[%c0_25, %c0_26, %c0_27] : memref<1x8x128xf32, #tpu.memory_space<vmem>>, vector<1x8x128xf32>
    tpu.vector_store %arg8[%c0_25, %c0_26, %c0_27], %48 {strides = array<i32>} : memref<1x8x128xf32, #tpu.memory_space<vmem>>, vector<1x8x128xf32>,
    return
  }
  func.func @transform_0(%arg0: i32) -> (i32, i32) {
    %c0_i32 = arith.constant 0 : i32
    %c0_i32_0 = arith.constant 0 : i32
    return %arg0, %c0_i32 : i32, i32
  }
  func.func @transform_1(%arg0: i32) -> (i32, i32) {
    %c0_i32 = arith.constant 0 : i32
    %c0_i32_0 = arith.constant 0 : i32
    %c0_i32_1 = arith.constant 0 : i32
    return %c0_i32, %c0_i32_0 : i32, i32
  }
  func.func @transform_2(%arg0: i32) -> (i32, i32) {
    %c0_i32 = arith.constant 0 : i32
    %c0_i32_0 = arith.constant 0 : i32
    return %arg0, %c0_i32 : i32, i32
  }
  func.func @transform_3(%arg0: i32) -> (i32, i32) {
    %c0_i32 = arith.constant 0 : i32
    %c0_i32_0 = arith.constant 0 : i32
    %c0_i32_1 = arith.constant 0 : i32
    return %c0_i32, %c0_i32_0 : i32, i32
  }
  func.func @transform_4(%arg0: i32) -> (i32, i32) {
    %c0_i32 = arith.constant 0 : i32
    %c0_i32_0 = arith.constant 0 : i32
    return %arg0, %c0_i32 : i32, i32
  }
  func.func @transform_5(%arg0: i32) -> (i32, i32) {
    %c0_i32 = arith.constant 0 : i32
    %c0_i32_0 = arith.constant 0 : i32
    return %arg0, %c0_i32 : i32, i32
  }
  func.func @transform_6(%arg0: i32) -> (i32, i32, i32) {
    %c0_i32 = arith.constant 0 : i32
    %c0_i32_0 = arith.constant 0 : i32
    %c0_i32_1 = arith.constant 0 : i32
    return %arg0, %c0_i32, %c0_i32_0 : i32, i32, i32
  }
  func.func @transform_7(%arg0: i32) -> (i32, i32, i32) {
    %c0_i32 = arith.constant 0 : i32
    %c0_i32_0 = arith.constant 0 : i32
    %c0_i32_1 = arith.constant 0 : i32
    return %arg0, %c0_i32, %c0_i32_0 : i32, i32, i32
  }
}

</mosaic_0001>

<bundles_post_ra>
// kernel: basic_block_forward.5
= control target key start
LH: loop header
LB: loop body
LE: loop exit
PB: predicated region body
PF: predicated region fallthrough
CT: control target
= control target key end

     0   :  { %s287_s0 = inlined_call_operand.vmem [shape: f32[128,128], index: 0, kind: input, shape index: {}]   ;;  %s288_s1 = inlined_call_operand.vmem [shape: f32[1,128], index: 1, kind: input, shape index: {}]   ;;  %s289_s2 = inlined_call_operand.vmem [shape: f32[1,128], index: 2, kind: input, shape index: {}]   ;;  %s290_s3 = inlined_call_operand.vmem [shape: bf16[128,128], index: 3, kind: output, shape index: {}]  }
   0x1   :  { %v14_v0 = vld [vmem:[%s287_s0] sm:$0xff]  ;;  %v15_v1 = vld [vmem:[%s287_s0 + $0x8] sm:$0xff]  ;;  %v16_v4 = vld [vmem:[%s287_s0 + $0x10] sm:$0xff] }
   0x2   :  { %v169_v2 = vld [vmem:[%s288_s1] ss:$0 sm:$0xff]  ;;  %v17_v5 = vld [vmem:[%s287_s0 + $0x18] sm:$0xff]  ;;  %v19_v11 = vld [vmem:[%s287_s0 + $0x28] sm:$0xff] }
   0x3   :  { %v203_v3 = vld [vmem:[%s289_s2] ss:$0 sm:$0xff]  ;;  %v34_v7 = vmul.f32 %v169_v2, %v14_v0  ;;  %v35_v8 = vmul.f32 %v169_v2, %v15_v1  ;;  %v36_v9 = vmul.f32 %v169_v2, %v16_v4  ;;  %v37_v10 = vmul.f32 %v169_v2, %v17_v5  ;;  %v20_v12 = vld [vmem:[%s287_s0 + $0x30] sm:$0xff]  ;;  %v21_v13 = vld [vmem:[%s287_s0 + $0x38] sm:$0xff] }
   0x4   :  { %v18_v6 = vld [vmem:[%s287_s0 + $0x20] sm:$0xff]  ;;  %v39_v15 = vmul.f32 %v169_v2, %v19_v11  ;;  %v40_v16 = vmul.f32 %v169_v2, %v20_v12  ;;  %v41_v17 = vmul.f32 %v169_v2, %v21_v13  ;;  %v23_v27 = vld [vmem:[%s287_s0 + $0x48] sm:$0xff]  ;;  %v24_v32 = vld [vmem:[%s287_s0 + $0x50] sm:$0xff] }
   0x5   :  { %v38_v14 = vmul.f32 %v169_v2, %v18_v6  ;;  %v54_v18 = vadd.f32 %v203_v3, %v34_v7  ;;  %v55_v19 = vadd.f32 %v203_v3, %v35_v8  ;;  %v56_v20 = vadd.f32 %v203_v3, %v36_v9  ;;  %v22_v26 = vld [vmem:[%s287_s0 + $0x40] sm:$0xff]  ;;  %v25_v33 = vld [vmem:[%s287_s0 + $0x58] sm:$0xff]  ;;  %v27_v39 = vld [vmem:[%s287_s0 + $0x68] sm:$0xff] }
   0x6   :  { %v57_v21 = vadd.f32 %v203_v3, %v37_v10  ;;  %v59_v23 = vadd.f32 %v203_v3, %v39_v15  ;;  %v60_v24 = vadd.f32 %v203_v3, %v40_v16  ;;  %v61_v25 = vadd.f32 %v203_v3, %v41_v17  ;;  %v26_v38 = vld [vmem:[%s287_s0 + $0x60] sm:$0xff]  ;;  %v28_v44 = vld [vmem:[%s287_s0 + $0x70] sm:$0xff]  ;;  %v29_v45 = vld [vmem:[%s287_s0 + $0x78] sm:$0xff] }
   0x7   :  { %v58_v22 = vadd.f32 %v203_v3, %v38_v14  ;;  %v70_v28 = vmax.f32 %v54_v18, 0.0  ;;  %v71_v29 = vmax.f32 %v55_v19, 0.0  ;;  %v72_v30 = vmax.f32 %v56_v20, 0.0 }
   0x8   :  { %v73_v31 = vmax.f32 %v57_v21, 0.0  ;;  %v75_v35 = vmax.f32 %v59_v23, 0.0  ;;  %v76_v36 = vmax.f32 %v60_v24, 0.0  ;;  %v77_v37 = vmax.f32 %v61_v25, 0.0 }
   0x9   :  { %v74_v34 = vmax.f32 %v58_v22, 0.0  ;;  %v125_v40 = vpack.c.bf16 %v71_v29, %v70_v28  ;;  %v42_v42 = vmul.f32 %v169_v2, %v22_v26  ;;  %v43_v43 = vmul.f32 %v169_v2, %v23_v27 }
   0xa   :  { %v130_v41 = vpack.c.bf16 %v73_v31, %v72_v30  ;;  %v140_v47 = vpack.c.bf16 %v77_v37, %v76_v36  ;;  %v44_v48 = vmul.f32 %v169_v2, %v24_v32  ;;  %v45_v49 = vmul.f32 %v169_v2, %v25_v33 }
   0xb   :  { %v135_v46 = vpack.c.bf16 %v75_v35, %v74_v34  ;;  %126 = vst [vmem:[%s290_s3] sm:$0xff] %v125_v40   ;;  %v62_v50 = vadd.f32 %v203_v3, %v42_v42  ;;  %v63_v51 = vadd.f32 %v203_v3, %v43_v43  ;;  %v46_v52 = vmul.f32 %v169_v2, %v26_v38 }
   0xc   :  { %v47_v53 = vmul.f32 %v169_v2, %v27_v39  ;;  %162 = vst [vmem:[%s290_s3 + $0x8] sm:$0xff] %v130_v41   ;;  %v64_v54 = vadd.f32 %v203_v3, %v44_v48  ;;  %v65_v55 = vadd.f32 %v203_v3, %v45_v49  ;;  %v48_v56 = vmul.f32 %v169_v2, %v28_v44 }
   0xd   :  { %v49_v57 = vmul.f32 %v169_v2, %v29_v45  ;;  %163 = vst [vmem:[%s290_s3 + $0x10] sm:$0xff] %v135_v46   ;;  %v78_v58 = vmax.f32 %v62_v50, 0.0  ;;  %v79_v59 = vmax.f32 %v63_v51, 0.0  ;;  %v66_v60 = vadd.f32 %v203_v3, %v46_v52 }
   0xe   :  { %v67_v61 = vadd.f32 %v203_v3, %v47_v53  ;;  %164 = vst [vmem:[%s290_s3 + $0x18] sm:$0xff] %v140_v47   ;;  %v80_v62 = vmax.f32 %v64_v54, 0.0  ;;  %v81_v63 = vmax.f32 %v65_v55, 0.0  ;;  %v68_v0 = vadd.f32 %v203_v3, %v48_v56 }
   0xf   :  { %v69_v1 = vadd.f32 %v203_v3, %v49_v57  ;;  %v145_v2 = vpack.c.bf16 %v79_v59, %v78_v58  ;;  %v82_v4 = vmax.f32 %v66_v60, 0.0 }
  0x10   :  { %v83_v5 = vmax.f32 %v67_v61, 0.0  ;;  %v150_v6 = vpack.c.bf16 %v81_v63, %v80_v62  ;;  %v84_v7 = vmax.f32 %v68_v0, 0.0 }
  0x11   :  { %v85_v8 = vmax.f32 %v69_v1, 0.0  ;;  %165 = vst [vmem:[%s290_s3 + $0x20] sm:$0xff] %v145_v2  }
  0x12   :  { %v155_v9 = vpack.c.bf16 %v83_v5, %v82_v4  ;;  %166 = vst [vmem:[%s290_s3 + $0x28] sm:$0xff] %v150_v6  }
  0x13   :  { %v160_v10 = vpack.c.bf16 %v85_v8, %v84_v7 }
  0x14   :  { %167 = vst [vmem:[%s290_s3 + $0x30] sm:$0xff] %v155_v9  }
  0x15   :  { %168 = vst [vmem:[%s290_s3 + $0x38] sm:$0xff] %v160_v10  }

// kernel: basic_block_forward.4
= control target key start
LH: loop header
LB: loop body
LE: loop exit
PB: predicated region body
PF: predicated region fallthrough
CT: control target
= control target key end

     0   :  { %s503_s1 = inlined_call_operand.vmem [shape: bf16[128,128], index: 1, kind: input, shape index: {}]   ;;  %s504_s0 = inlined_call_operand.vmem [shape: bf16[128,128], index: 0, kind: input, shape index: {}]   ;;  %s505_s2 = inlined_call_operand.vmem [shape: f32[128,128], index: 2, kind: output, shape index: {0}]   ;;  %s506_s3 = inlined_call_operand.vmem [shape: f32[1,8,128], index: 3, kind: output, shape index: {1}]  }
   0x1   :  { %v359_v0 = vld [vmem:[%s503_s1 + $0x38] sm:$0xff]  ;;  %v358_v1 = vld [vmem:[%s503_s1 + $0x30] sm:$0xff]  ;;  %v357_v2 = vld [vmem:[%s503_s1 + $0x28] sm:$0xff] }
   0x2   :  { %141 = vmatpush.bf16.msra.mxu0 %v359_v0  ;;  %360 = vmatpush.bf16.msra.mxu1 %v359_v0  ;;  %v356_v3 = vld [vmem:[%s503_s1 + $0x20] sm:$0xff]  ;;  %v355_v4 = vld [vmem:[%s503_s1 + $0x18] sm:$0xff]  ;;  %v354_v5 = vld [vmem:[%s503_s1 + $0x10] sm:$0xff] }
   0x3   :  { %361 = vmatpush.bf16.msra.mxu2 %v359_v0  ;;  %362 = vmatpush.bf16.msra.mxu3 %v359_v0  ;;  %v353_v6 = vld [vmem:[%s503_s1 + $0x8] sm:$0xff]  ;;  %v352_v7 = vld [vmem:[%s503_s1] sm:$0xff]  ;;  %v346_v9 = vld [vmem:[%s504_s0 + $0x10] sm:$0xff] }
   0x4   :  { %v344_v8 = vld [vmem:[%s504_s0] sm:$0xff]  ;;  %v350_v11 = vld [vmem:[%s504_s0 + $0x30] sm:$0xff]  ;;  %v345_v12 = vld [vmem:[%s504_s0 + $0x8] sm:$0xff] }
   0x5   :  { %v348_v10 = vld [vmem:[%s504_s0 + $0x20] sm:$0xff]  ;;  %v347_v13 = vld [vmem:[%s504_s0 + $0x18] sm:$0xff]  ;;  %v349_v14 = vld [vmem:[%s504_s0 + $0x28] sm:$0xff] }
   0x6   :  { %142 = vmatpush.bf16.msra.mxu0 %v358_v1  ;;  %363 = vmatpush.bf16.msra.mxu1 %v358_v1  ;;  %v351_v15 = vld [vmem:[%s504_s0 + $0x38] sm:$0xff] }
   0x7   :  { %364 = vmatpush.bf16.msra.mxu2 %v358_v1  ;;  %365 = vmatpush.bf16.msra.mxu3 %v358_v1 }
   0xa   :  { %143 = vmatpush.bf16.msra.mxu0 %v357_v2  ;;  %366 = vmatpush.bf16.msra.mxu1 %v357_v2 }
   0xb   :  { %367 = vmatpush.bf16.msra.mxu2 %v357_v2  ;;  %368 = vmatpush.bf16.msra.mxu3 %v357_v2 }
   0xe   :  { %144 = vmatpush.bf16.msra.mxu0 %v356_v3  ;;  %369 = vmatpush.bf16.msra.mxu1 %v356_v3 }
   0xf   :  { %370 = vmatpush.bf16.msra.mxu2 %v356_v3  ;;  %371 = vmatpush.bf16.msra.mxu3 %v356_v3 }
  0x12   :  { %145 = vmatpush.bf16.msra.mxu0 %v355_v4  ;;  %372 = vmatpush.bf16.msra.mxu1 %v355_v4 }
  0x13   :  { %373 = vmatpush.bf16.msra.mxu2 %v355_v4  ;;  %374 = vmatpush.bf16.msra.mxu3 %v355_v4 }
  0x16   :  { %146 = vmatpush.bf16.msra.mxu0 %v354_v5  ;;  %375 = vmatpush.bf16.msra.mxu1 %v354_v5 }
  0x17   :  { %376 = vmatpush.bf16.msra.mxu2 %v354_v5  ;;  %377 = vmatpush.bf16.msra.mxu3 %v354_v5 }
  0x1a   :  { %147 = vmatpush.bf16.msra.mxu0 %v353_v6  ;;  %378 = vmatpush.bf16.msra.mxu1 %v353_v6 }
  0x1b   :  { %379 = vmatpush.bf16.msra.mxu2 %v353_v6  ;;  %380 = vmatpush.bf16.msra.mxu3 %v353_v6 }
  0x1e   :  { %148 = vmatpush.bf16.msra.mxu0 %v352_v7  ;;  %381 = vmatpush.bf16.msra.mxu1 %v352_v7 }
  0x1f   :  { %382 = vmatpush.bf16.msra.mxu2 %v352_v7  ;;  %383 = vmatpush.bf16.msra.mxu3 %v352_v7 }
  0x21   :  { %149 = vmatmul.bf16.vlgmr.msra.gmra.mxu0 %v344_v8  ;;  %159 = vmatmul.bf16.vlgmr.msra.gmra.mxu1 %v346_v9 }
  0x22   :  { %169 = vmatmul.bf16.vlgmr.msra.gmra.mxu2 %v348_v10  ;;  %179 = vmatmul.bf16.vlgmr.msra.gmra.mxu3 %v350_v11 }
  0x31   :  { %154 = vmatmul.bf16.gmra.mxu0 %v345_v12  ;;  %164 = vmatmul.bf16.gmra.mxu1 %v347_v13 }
  0x32   :  { %174 = vmatmul.bf16.gmra.mxu2 %v349_v14  ;;  %184 = vmatmul.bf16.gmra.mxu3 %v351_v15 }
  0x9e   :  { %v150_v16 = vpop.f32.mrf.mxu0  ;;  %v160_v17 = vpop.f32.mrf.mxu1 }
  0x9f   :  { %190 = vst [vmem:[%s505_s2] sm:$0xff] %v150_v16  ;;  %v227_v27 = vmul.f32 %v150_v16, %v150_v16  ;;  %v231_v39 = vmul.f32 %v160_v17, %v160_v17 }
  0xa0   :  { %194 = vst [vmem:[%s505_s2 + $0x20] sm:$0xff] %v160_v17 }
  0xa5   :  { %v170_v18 = vpop.f32.mrf.mxu2  ;;  %v180_v19 = vpop.f32.mrf.mxu3 }
  0xa6   :  { %v152_v20 = vpop.f32.mrf.mxu0  ;;  %v162_v21 = vpop.f32.mrf.mxu1  ;;  %198 = vst [vmem:[%s505_s2 + $0x40] sm:$0xff] %v170_v18  ;;  %v235_v53 = vmul.f32 %v170_v18, %v170_v18  ;;  %v239_v1 = vmul.f32 %v180_v19, %v180_v19 }
  0xa7   :  { %191 = vst [vmem:[%s505_s2 + $0x8] sm:$0xff] %v152_v20  ;;  %v228_v26 = vmul.f32 %v152_v20, %v152_v20  ;;  %v206_v28 = vadd.f32 %v152_v20, %v150_v16  ;;  %v232_v42 = vmul.f32 %v162_v21, %v162_v21 }
  0xa8   :  { %195 = vst [vmem:[%s505_s2 + $0x28] sm:$0xff] %v162_v21 }
  0xa9   :  { %202 = vst [vmem:[%s505_s2 + $0x60] sm:$0xff] %v180_v19  ;;  %v243_v30 = vadd.f32 %v228_v26, %v227_v27 }
  0xad   :  { %v172_v22 = vpop.f32.mrf.mxu2  ;;  %v182_v23 = vpop.f32.mrf.mxu3 }
  0xae   :  { %v155_v24 = vpop.f32.mrf.mxu0  ;;  %v165_v25 = vpop.f32.mrf.mxu1  ;;  %199 = vst [vmem:[%s505_s2 + $0x48] sm:$0xff] %v172_v22  ;;  %v236_v56 = vmul.f32 %v172_v22, %v172_v22  ;;  %v240_v4 = vmul.f32 %v182_v23, %v182_v23 }
  0xaf   :  { %192 = vst [vmem:[%s505_s2 + $0x10] sm:$0xff] %v155_v24  ;;  %v229_v29 = vmul.f32 %v155_v24, %v155_v24  ;;  %v207_v31 = vadd.f32 %v206_v28, %v155_v24  ;;  %v233_v45 = vmul.f32 %v165_v25, %v165_v25 }
  0xb0   :  { %196 = vst [vmem:[%s505_s2 + $0x30] sm:$0xff] %v165_v25 }
  0xb1   :  { %203 = vst [vmem:[%s505_s2 + $0x68] sm:$0xff] %v182_v23  ;;  %v244_v36 = vadd.f32 %v243_v30, %v229_v29 }
  0xb5   :  { %v175_v32 = vpop.f32.mrf.mxu2  ;;  %v185_v33 = vpop.f32.mrf.mxu3 }
  0xb6   :  { %v157_v34 = vpop.f32.mrf.mxu0  ;;  %v167_v35 = vpop.f32.mrf.mxu1  ;;  %200 = vst [vmem:[%s505_s2 + $0x50] sm:$0xff] %v175_v32  ;;  %v237_v60 = vmul.f32 %v175_v32, %v175_v32  ;;  %v241_v8 = vmul.f32 %v185_v33, %v185_v33 }
  0xb7   :  { %193 = vst [vmem:[%s505_s2 + $0x18] sm:$0xff] %v157_v34  ;;  %v208_v37 = vadd.f32 %v207_v31, %v157_v34  ;;  %v230_v38 = vmul.f32 %v157_v34, %v157_v34  ;;  %v234_v51 = vmul.f32 %v167_v35, %v167_v35 }
  0xb8   :  { %197 = vst [vmem:[%s505_s2 + $0x38] sm:$0xff] %v167_v35 }
  0xb9   :  { %v209_v40 = vadd.f32 %v208_v37, %v160_v17  ;;  %v245_v41 = vadd.f32 %v244_v36, %v230_v38  ;;  %204 = vst [vmem:[%s505_s2 + $0x70] sm:$0xff] %v185_v33  ;;  %v264_v17 = vlaneseq }
  0xbb   :  { %v246_v43 = vadd.f32 %v245_v41, %v231_v39  ;;  %v210_v44 = vadd.f32 %v209_v40, %v162_v21 }
  0xbd   :  { %v211_v46 = vadd.f32 %v210_v44, %v165_v25  ;;  %v247_v47 = vadd.f32 %v246_v43, %v232_v42  ;;  %v177_v48 = vpop.f32.mrf.mxu2  ;;  %v187_v49 = vpop.f32.mrf.mxu3 }
  0xbe   :  { %201 = vst [vmem:[%s505_s2 + $0x58] sm:$0xff] %v177_v48  ;;  %v238_v0 = vmul.f32 %v177_v48, %v177_v48  ;;  %v242_v12 = vmul.f32 %v187_v49, %v187_v49 }
  0xbf   :  { %v212_v50 = vadd.f32 %v211_v46, %v167_v35  ;;  %v248_v52 = vadd.f32 %v247_v47, %v233_v45  ;;  %205 = vst [vmem:[%s505_s2 + $0x78] sm:$0xff] %v187_v49 }
  0xc1   :  { %v213_v54 = vadd.f32 %v212_v50, %v170_v18  ;;  %v249_v55 = vadd.f32 %v248_v52, %v234_v51 }
  0xc3   :  { %v250_v57 = vadd.f32 %v249_v55, %v235_v53  ;;  %v214_v58 = vadd.f32 %v213_v54, %v172_v22 }
  0xc5   :  { %v215_v59 = vadd.f32 %v214_v58, %v175_v32  ;;  %v251_v61 = vadd.f32 %v250_v57, %v236_v56 }
  0xc7   :  { %v252_v62 = vadd.f32 %v251_v61, %v237_v60  ;;  %v216_v63 = vadd.f32 %v215_v59, %v177_v48 }
  0xc9   :  { %v217_v2 = vadd.f32 %v216_v63, %v180_v19  ;;  %v253_v3 = vadd.f32 %v252_v62, %v238_v0  ;;  %v265_v19 = vshrl.u32 %v264_v17, 7 }
  0xcb   :  { %v254_v5 = vadd.f32 %v253_v3, %v239_v1  ;;  %v218_v6 = vadd.f32 %v217_v2, %v182_v23  ;;  %vm266_vm0 = vcmp.eq.s32.totalorder %v265_v19, 0  ;;  %vm268_vm1 = vcmp.eq.s32.totalorder %v265_v19, 1 }
  0xcd   :  { %v219_v7 = vadd.f32 %v218_v6, %v185_v33  ;;  %v255_v9 = vadd.f32 %v254_v5, %v240_v4 }
  0xcf   :  { %v256_v10 = vadd.f32 %v255_v9, %v241_v8  ;;  %v220_v11 = vadd.f32 %v219_v7, %v187_v49 }
  0xd1   :  { %v221_v13 = vrot.slane %v220_v11, 4  ;;  %v257_v14 = vadd.f32 %v256_v10, %v242_v12 }
  0xd3   :  { %v222_v15 = vadd.f32 %v221_v13, %v220_v11  ;;  %v258_v16 = vrot.slane %v257_v14, 4 }
  0xd5   :  { %v223_v18 = vrot.slane %v222_v15, 2  ;;  %v259_v20 = vadd.f32 %v258_v16, %v257_v14 }
  0xd7   :  { %v224_v21 = vadd.f32 %v223_v18, %v222_v15  ;;  %v260_v22 = vrot.slane %v259_v20, 2 }
  0xd9   :  { %v225_v24 = vrot.slane %v224_v21, 1  ;;  %v261_v25 = vadd.f32 %v260_v22, %v259_v20 }
  0xdb   :  { %v226_v26 = vadd.f32 %v225_v24, %v224_v21  ;;  %v262_v23 = vrot.slane %v261_v25, 1 }
  0xdd   :  { %v263_v27 = vadd.f32 %v262_v23, %v261_v25  ;;  %v267_v28 = vsel %vm266_vm0, %v226_v26, 0.0 }
  0xdf   :  { %v269_v29 = vsel %vm268_vm1, %v263_v27, 0.0 }
  0xe0   :  { %v270_v30 = vadd.f32 %v269_v29, %v267_v28 }
  0xe2   :  { %271 = vst [vmem:[%s506_s3] sm:$0xff] %v270_v30 }

// kernel: basic_block_forward.7
= control target key start
LH: loop header
LB: loop body
LE: loop exit
PB: predicated region body
PF: predicated region fallthrough
CT: control target
= control target key end

     0   :  { %s454_s0 = inlined_call_operand.vmem [shape: f32[128,128], index: 0, kind: input, shape index: {}]   ;;  %s455_s1 = inlined_call_operand.vmem [shape: f32[128,128], index: 1, kind: input, shape index: {}]   ;;  %s456_s2 = inlined_call_operand.vmem [shape: f32[1,128], index: 2, kind: input, shape index: {}]   ;;  %s457_s3 = inlined_call_operand.vmem [shape: f32[1,128], index: 3, kind: input, shape index: {}]   ;;  %s458_s4 = inlined_call_operand.vmem [shape: f32[1,128], index: 4, kind: input, shape index: {}]   ;;  %s459_s5 = inlined_call_operand.vmem [shape: f32[1,128], index: 5, kind: input, shape index: {}]   ;;  %s460_s6 = inlined_call_operand.vmem [shape: f32[128,128], index: 6, kind: output, shape index: {}]  }
   0x1   :  { %v23_v0 = vld [vmem:[%s454_s0] sm:$0xff]  ;;  %v24_v7 = vld [vmem:[%s454_s0 + $0x8] sm:$0xff]  ;;  %v25_v13 = vld [vmem:[%s454_s0 + $0x10] sm:$0xff] }
   0x2   :  { %v232_v1 = vld [vmem:[%s456_s2] ss:$0 sm:$0xff]  ;;  %v80_v8 = vld [vmem:[%s455_s1 + $0x8] sm:$0xff]  ;;  %v81_v14 = vld [vmem:[%s455_s1 + $0x10] sm:$0xff] }
   0x3   :  { %v237_v2 = vld [vmem:[%s457_s3] ss:$0 sm:$0xff]  ;;  %v43_v4 = vmul.f32 %v232_v1, %v23_v0  ;;  %v44_v11 = vmul.f32 %v232_v1, %v24_v7  ;;  %v26_v15 = vld [vmem:[%s454_s0 + $0x18] sm:$0xff]  ;;  %v45_v16 = vmul.f32 %v232_v1, %v25_v13  ;;  %v28_v26 = vld [vmem:[%s454_s0 + $0x28] sm:$0xff] }
   0x4   :  { %v79_v3 = vld [vmem:[%s455_s1] sm:$0xff]  ;;  %v46_v18 = vmul.f32 %v232_v1, %v26_v15  ;;  %v82_v19 = vld [vmem:[%s455_s1 + $0x18] sm:$0xff]  ;;  %v84_v27 = vld [vmem:[%s455_s1 + $0x28] sm:$0xff]  ;;  %v48_v32 = vmul.f32 %v232_v1, %v28_v26 }
   0x5   :  { %v246_v5 = vld [vmem:[%s458_s4] ss:$0 sm:$0xff]  ;;  %v63_v9 = vadd.f32 %v237_v2, %v43_v4  ;;  %v64_v23 = vadd.f32 %v237_v2, %v44_v11  ;;  %v29_v28 = vld [vmem:[%s454_s0 + $0x30] sm:$0xff]  ;;  %v65_v29 = vadd.f32 %v237_v2, %v45_v16  ;;  %v30_v42 = vld [vmem:[%s454_s0 + $0x38] sm:$0xff] }
   0x6   :  { %v251_v6 = vld [vmem:[%s459_s5] ss:$0 sm:$0xff]  ;;  %v99_v10 = vmul.f32 %v246_v5, %v79_v3  ;;  %v100_v12 = vmul.f32 %v246_v5, %v80_v8  ;;  %v101_v17 = vmul.f32 %v246_v5, %v81_v14  ;;  %v102_v24 = vmul.f32 %v246_v5, %v82_v19  ;;  %v85_v33 = vld [vmem:[%s455_s1 + $0x30] sm:$0xff]  ;;  %v86_v43 = vld [vmem:[%s455_s1 + $0x38] sm:$0xff] }
   0x7   :  { %v27_v20 = vld [vmem:[%s454_s0 + $0x20] sm:$0xff]  ;;  %v66_v30 = vadd.f32 %v237_v2, %v46_v18  ;;  %v104_v37 = vmul.f32 %v246_v5, %v84_v27  ;;  %v68_v40 = vadd.f32 %v237_v2, %v48_v32  ;;  %v49_v41 = vmul.f32 %v232_v1, %v29_v28  ;;  %v32_v58 = vld [vmem:[%s454_s0 + $0x48] sm:$0xff]  ;;  %v33_v0 = vld [vmem:[%s454_s0 + $0x50] sm:$0xff] }
   0x8   :  { %v83_v21 = vld [vmem:[%s455_s1 + $0x20] sm:$0xff]  ;;  %v115_v22 = vadd.f32 %v99_v10, %v63_v9  ;;  %v47_v25 = vmul.f32 %v232_v1, %v27_v20  ;;  %v116_v35 = vadd.f32 %v100_v12, %v64_v23  ;;  %v117_v38 = vadd.f32 %v101_v17, %v65_v29  ;;  %v88_v59 = vld [vmem:[%s455_s1 + $0x48] sm:$0xff]  ;;  %v89_v3 = vld [vmem:[%s455_s1 + $0x50] sm:$0xff] }
   0x9   :  { %v103_v31 = vmul.f32 %v246_v5, %v83_v21  ;;  %v118_v39 = vadd.f32 %v102_v24, %v66_v30  ;;  %v105_v47 = vmul.f32 %v246_v5, %v85_v33  ;;  %v120_v50 = vadd.f32 %v104_v37, %v68_v40  ;;  %v31_v52 = vld [vmem:[%s454_s0 + $0x40] sm:$0xff]  ;;  %v34_v10 = vld [vmem:[%s454_s0 + $0x58] sm:$0xff] }
   0xa   :  { %v135_v34 = vadd.f32 %v251_v6, %v115_v22  ;;  %v67_v36 = vadd.f32 %v237_v2, %v47_v25  ;;  %v136_v45 = vadd.f32 %v251_v6, %v116_v35  ;;  %v137_v48 = vadd.f32 %v251_v6, %v117_v38  ;;  %v87_v53 = vld [vmem:[%s455_s1 + $0x40] sm:$0xff]  ;;  %v90_v11 = vld [vmem:[%s455_s1 + $0x58] sm:$0xff]  ;;  %v36_v22 = vld [vmem:[%s454_s0 + $0x68] sm:$0xff] }
   0xb   :  { %v138_v49 = vadd.f32 %v251_v6, %v118_v39  ;;  %v69_v51 = vadd.f32 %v237_v2, %v49_v41  ;;  %v50_v56 = vmul.f32 %v232_v1, %v30_v42  ;;  %v106_v57 = vmul.f32 %v246_v5, %v86_v43  ;;  %v35_v16 = vld [vmem:[%s454_s0 + $0x60] sm:$0xff]  ;;  %v93_v41 = vld [vmem:[%s455_s1 + $0x70] sm:$0xff] }
   0xc   :  { %v151_v44 = vmax.f32 %v135_v34, 0.0  ;;  %v119_v46 = vadd.f32 %v103_v31, %v67_v36  ;;  %v152_v54 = vmax.f32 %v136_v45, 0.0  ;;  %v153_v60 = vmax.f32 %v137_v48, 0.0  ;;  %v91_v21 = vld [vmem:[%s455_s1 + $0x60] sm:$0xff]  ;;  %v92_v31 = vld [vmem:[%s455_s1 + $0x68] sm:$0xff]  ;;  %v37_v36 = vld [vmem:[%s454_s0 + $0x70] sm:$0xff] }
   0xd   :  { %v154_v61 = vmax.f32 %v138_v49, 0.0  ;;  %v140_v62 = vadd.f32 %v251_v6, %v120_v50  ;;  %v121_v63 = vadd.f32 %v105_v47, %v69_v51  ;;  %v70_v7 = vadd.f32 %v237_v2, %v50_v56  ;;  %v94_v51 = vld [vmem:[%s455_s1 + $0x78] sm:$0xff] }
   0xe   :  { %167 = vst [vmem:[%s460_s6] sm:$0xff] %v151_v44  ;;  %v139_v55 = vadd.f32 %v251_v6, %v119_v46  ;;  %v51_v8 = vmul.f32 %v232_v1, %v31_v52  ;;  %v107_v9 = vmul.f32 %v246_v5, %v87_v53  ;;  %v52_v14 = vmul.f32 %v232_v1, %v32_v58  ;;  %v38_v46 = vld [vmem:[%s454_s0 + $0x78] sm:$0xff] }
   0xf   :  { %168 = vst [vmem:[%s460_s6 + $0x8] sm:$0xff] %v152_v54  ;;  %v156_v12 = vmax.f32 %v140_v62, 0.0  ;;  %v141_v13 = vadd.f32 %v251_v6, %v121_v63  ;;  %v108_v15 = vmul.f32 %v246_v5, %v88_v59  ;;  %v122_v17 = vadd.f32 %v106_v57, %v70_v7 }
  0x10   :  { %v155_v4 = vmax.f32 %v139_v55, 0.0  ;;  %169 = vst [vmem:[%s460_s6 + $0x10] sm:$0xff] %v153_v60  ;;  %v71_v18 = vadd.f32 %v237_v2, %v51_v8  ;;  %v53_v19 = vmul.f32 %v232_v1, %v33_v0  ;;  %v109_v20 = vmul.f32 %v246_v5, %v89_v3 }
  0x11   :  { %170 = vst [vmem:[%s460_s6 + $0x18] sm:$0xff] %v154_v61  ;;  %v157_v23 = vmax.f32 %v141_v13, 0.0  ;;  %v72_v24 = vadd.f32 %v237_v2, %v52_v14  ;;  %v54_v25 = vmul.f32 %v232_v1, %v34_v10  ;;  %v110_v26 = vmul.f32 %v246_v5, %v90_v11 }
  0x12   :  { %171 = vst [vmem:[%s460_s6 + $0x20] sm:$0xff] %v155_v4  ;;  %v142_v27 = vadd.f32 %v251_v6, %v122_v17  ;;  %v123_v28 = vadd.f32 %v107_v9, %v71_v18  ;;  %v73_v29 = vadd.f32 %v237_v2, %v53_v19  ;;  %v55_v30 = vmul.f32 %v232_v1, %v35_v16 }
  0x13   :  { %172 = vst [vmem:[%s460_s6 + $0x28] sm:$0xff] %v156_v12  ;;  %v124_v32 = vadd.f32 %v108_v15, %v72_v24  ;;  %v74_v33 = vadd.f32 %v237_v2, %v54_v25  ;;  %v111_v34 = vmul.f32 %v246_v5, %v91_v21  ;;  %v56_v35 = vmul.f32 %v232_v1, %v36_v22 }
  0x14   :  { %173 = vst [vmem:[%s460_s6 + $0x30] sm:$0xff] %v157_v23  ;;  %v158_v37 = vmax.f32 %v142_v27, 0.0  ;;  %v143_v38 = vadd.f32 %v251_v6, %v123_v28  ;;  %v125_v39 = vadd.f32 %v109_v20, %v73_v29  ;;  %v75_v40 = vadd.f32 %v237_v2, %v55_v30 }
  0x15   :  { %v144_v42 = vadd.f32 %v251_v6, %v124_v32  ;;  %v126_v43 = vadd.f32 %v110_v26, %v74_v33  ;;  %v76_v44 = vadd.f32 %v237_v2, %v56_v35  ;;  %v112_v45 = vmul.f32 %v246_v5, %v92_v31 }
  0x16   :  { %174 = vst [vmem:[%s460_s6 + $0x38] sm:$0xff] %v158_v37  ;;  %v159_v47 = vmax.f32 %v143_v38, 0.0  ;;  %v145_v48 = vadd.f32 %v251_v6, %v125_v39  ;;  %v127_v49 = vadd.f32 %v111_v34, %v75_v40  ;;  %v57_v50 = vmul.f32 %v232_v1, %v37_v36 }
  0x17   :  { %v160_v52 = vmax.f32 %v144_v42, 0.0  ;;  %v146_v53 = vadd.f32 %v251_v6, %v126_v43  ;;  %v128_v54 = vadd.f32 %v112_v45, %v76_v44  ;;  %v113_v55 = vmul.f32 %v246_v5, %v93_v41 }
  0x18   :  { %175 = vst [vmem:[%s460_s6 + $0x40] sm:$0xff] %v159_v47  ;;  %v161_v56 = vmax.f32 %v145_v48, 0.0  ;;  %v147_v57 = vadd.f32 %v251_v6, %v127_v49  ;;  %v77_v58 = vadd.f32 %v237_v2, %v57_v50  ;;  %v58_v59 = vmul.f32 %v232_v1, %v38_v46 }
  0x19   :  { %176 = vst [vmem:[%s460_s6 + $0x48] sm:$0xff] %v160_v52  ;;  %v162_v60 = vmax.f32 %v146_v53, 0.0  ;;  %v148_v61 = vadd.f32 %v251_v6, %v128_v54  ;;  %v114_v62 = vmul.f32 %v246_v5, %v94_v51 }
  0x1a   :  { %177 = vst [vmem:[%s460_s6 + $0x50] sm:$0xff] %v161_v56  ;;  %v163_v63 = vmax.f32 %v147_v57, 0.0  ;;  %v129_v0 = vadd.f32 %v113_v55, %v77_v58  ;;  %v78_v3 = vadd.f32 %v237_v2, %v58_v59 }
  0x1b   :  { %178 = vst [vmem:[%s460_s6 + $0x58] sm:$0xff] %v162_v60  ;;  %v164_v1 = vmax.f32 %v148_v61, 0.0 }
  0x1c   :  { %179 = vst [vmem:[%s460_s6 + $0x60] sm:$0xff] %v163_v63  ;;  %v149_v4 = vadd.f32 %v251_v6, %v129_v0  ;;  %v130_v5 = vadd.f32 %v114_v62, %v78_v3 }
  0x1d   :  { %180 = vst [vmem:[%s460_s6 + $0x68] sm:$0xff] %v164_v1 }
  0x1e   :  { %v165_v7 = vmax.f32 %v149_v4, 0.0  ;;  %v150_v8 = vadd.f32 %v251_v6, %v130_v5 }
  0x20   :  { %181 = vst [vmem:[%s460_s6 + $0x70] sm:$0xff] %v165_v7  ;;  %v166_v2 = vmax.f32 %v150_v8, 0.0 }
  0x22   :  { %182 = vst [vmem:[%s460_s6 + $0x78] sm:$0xff] %v166_v2 }

// kernel: basic_block_forward.6
= control target key start
LH: loop header
LB: loop body
LE: loop exit
PB: predicated region body
PF: predicated region fallthrough
CT: control target
= control target key end

     0   :  { %s1037_s1 = inlined_call_operand.vmem [shape: bf16[128,128], index: 1, kind: input, shape index: {}]   ;;  %s1038_s3 = inlined_call_operand.vmem [shape: bf16[128,128], index: 3, kind: input, shape index: {}]   ;;  %s1039_s0 = inlined_call_operand.vmem [shape: bf16[128,128], index: 0, kind: input, shape index: {}]   ;;  %s1040_s2 = inlined_call_operand.vmem [shape: bf16[128,128], index: 2, kind: input, shape index: {}]   ;;  %s1041_s4 = inlined_call_operand.vmem [shape: f32[128,128], index: 4, kind: output, shape index: {0}]   ;;  %s1042_s5 = inlined_call_operand.vmem [shape: f32[128,128], index: 5, kind: output, shape index: {1}]   ;;  %s1043_s6 = inlined_call_operand.vmem [shape: f32[1,8,128], index: 6, kind: output, shape index: {2}]   ;;  %s1044_s7 = inlined_call_operand.vmem [shape: f32[1,8,128], index: 7, kind: output, shape index: {3}]  }
   0x1   :  { %v694_v0 = vld [vmem:[%s1037_s1 + $0x38] sm:$0xff]  ;;  %v693_v2 = vld [vmem:[%s1037_s1 + $0x30] sm:$0xff]  ;;  %v692_v4 = vld [vmem:[%s1037_s1 + $0x28] sm:$0xff] }
   0x2   :  { %v710_v1 = vld [vmem:[%s1038_s3 + $0x38] sm:$0xff]  ;;  %149 = vmatpush.bf16.msra.mxu0 %v694_v0  ;;  %v709_v3 = vld [vmem:[%s1038_s3 + $0x30] sm:$0xff]  ;;  %711 = vmatpush.bf16.msra.mxu2 %v694_v0  ;;  %v708_v5 = vld [vmem:[%s1038_s3 + $0x28] sm:$0xff] }
   0x3   :  { %326 = vmatpush.bf16.msra.mxu1 %v710_v1  ;;  %719 = vmatpush.bf16.msra.mxu3 %v710_v1  ;;  %v691_v6 = vld [vmem:[%s1037_s1 + $0x20] sm:$0xff]  ;;  %v690_v8 = vld [vmem:[%s1037_s1 + $0x18] sm:$0xff]  ;;  %v689_v10 = vld [vmem:[%s1037_s1 + $0x10] sm:$0xff] }
   0x4   :  { %v707_v7 = vld [vmem:[%s1038_s3 + $0x20] sm:$0xff]  ;;  %v706_v9 = vld [vmem:[%s1038_s3 + $0x18] sm:$0xff]  ;;  %v705_v11 = vld [vmem:[%s1038_s3 + $0x10] sm:$0xff] }
   0x5   :  { %v688_v12 = vld [vmem:[%s1037_s1 + $0x8] sm:$0xff]  ;;  %v687_v14 = vld [vmem:[%s1037_s1] sm:$0xff]  ;;  %v681_v24 = vld [vmem:[%s1039_s0 + $0x10] sm:$0xff] }
   0x6   :  { %150 = vmatpush.bf16.msra.mxu0 %v693_v2  ;;  %712 = vmatpush.bf16.msra.mxu2 %v693_v2  ;;  %v704_v13 = vld [vmem:[%s1038_s3 + $0x8] sm:$0xff]  ;;  %v703_v15 = vld [vmem:[%s1038_s3] sm:$0xff]  ;;  %v697_v25 = vld [vmem:[%s1040_s2 + $0x10] sm:$0xff] }
   0x7   :  { %327 = vmatpush.bf16.msra.mxu1 %v709_v3  ;;  %720 = vmatpush.bf16.msra.mxu3 %v709_v3  ;;  %v679_v16 = vld [vmem:[%s1039_s0] sm:$0xff]  ;;  %v680_v20 = vld [vmem:[%s1039_s0 + $0x8] sm:$0xff]  ;;  %v685_v26 = vld [vmem:[%s1039_s0 + $0x30] sm:$0xff] }
   0x8   :  { %v695_v17 = vld [vmem:[%s1040_s2] sm:$0xff]  ;;  %v696_v21 = vld [vmem:[%s1040_s2 + $0x8] sm:$0xff]  ;;  %v701_v27 = vld [vmem:[%s1040_s2 + $0x30] sm:$0xff] }
   0x9   :  { %v683_v18 = vld [vmem:[%s1039_s0 + $0x20] sm:$0xff]  ;;  %v684_v22 = vld [vmem:[%s1039_s0 + $0x28] sm:$0xff]  ;;  %v682_v28 = vld [vmem:[%s1039_s0 + $0x18] sm:$0xff] }
   0xa   :  { %151 = vmatpush.bf16.msra.mxu0 %v692_v4  ;;  %713 = vmatpush.bf16.msra.mxu2 %v692_v4  ;;  %v699_v19 = vld [vmem:[%s1040_s2 + $0x20] sm:$0xff]  ;;  %v700_v23 = vld [vmem:[%s1040_s2 + $0x28] sm:$0xff]  ;;  %v698_v29 = vld [vmem:[%s1040_s2 + $0x18] sm:$0xff] }
   0xb   :  { %328 = vmatpush.bf16.msra.mxu1 %v708_v5  ;;  %721 = vmatpush.bf16.msra.mxu3 %v708_v5  ;;  %v686_v30 = vld [vmem:[%s1039_s0 + $0x38] sm:$0xff] }
   0xc   :  { %v702_v31 = vld [vmem:[%s1040_s2 + $0x38] sm:$0xff] }
   0xe   :  { %152 = vmatpush.bf16.msra.mxu0 %v691_v6  ;;  %714 = vmatpush.bf16.msra.mxu2 %v691_v6 }
   0xf   :  { %329 = vmatpush.bf16.msra.mxu1 %v707_v7  ;;  %722 = vmatpush.bf16.msra.mxu3 %v707_v7 }
  0x12   :  { %153 = vmatpush.bf16.msra.mxu0 %v690_v8  ;;  %715 = vmatpush.bf16.msra.mxu2 %v690_v8 }
  0x13   :  { %330 = vmatpush.bf16.msra.mxu1 %v706_v9  ;;  %723 = vmatpush.bf16.msra.mxu3 %v706_v9 }
  0x16   :  { %154 = vmatpush.bf16.msra.mxu0 %v689_v10  ;;  %716 = vmatpush.bf16.msra.mxu2 %v689_v10 }
  0x17   :  { %331 = vmatpush.bf16.msra.mxu1 %v705_v11  ;;  %724 = vmatpush.bf16.msra.mxu3 %v705_v11 }
  0x1a   :  { %155 = vmatpush.bf16.msra.mxu0 %v688_v12  ;;  %717 = vmatpush.bf16.msra.mxu2 %v688_v12 }
  0x1b   :  { %332 = vmatpush.bf16.msra.mxu1 %v704_v13  ;;  %725 = vmatpush.bf16.msra.mxu3 %v704_v13 }
  0x1e   :  { %156 = vmatpush.bf16.msra.mxu0 %v687_v14  ;;  %718 = vmatpush.bf16.msra.mxu2 %v687_v14 }
  0x1f   :  { %333 = vmatpush.bf16.msra.mxu1 %v703_v15  ;;  %726 = vmatpush.bf16.msra.mxu3 %v703_v15 }
  0x21   :  { %157 = vmatmul.bf16.vlgmr.msra.gmra.mxu0 %v679_v16  ;;  %177 = vmatmul.bf16.vlgmr.msra.gmra.mxu2 %v683_v18 }
  0x22   :  { %334 = vmatmul.bf16.vlgmr.msra.gmra.mxu1 %v695_v17  ;;  %354 = vmatmul.bf16.vlgmr.msra.gmra.mxu3 %v699_v19 }
  0x31   :  { %162 = vmatmul.bf16.gmra.mxu0 %v680_v20  ;;  %182 = vmatmul.bf16.gmra.mxu2 %v684_v22 }
  0x32   :  { %339 = vmatmul.bf16.gmra.mxu1 %v696_v21  ;;  %359 = vmatmul.bf16.gmra.mxu3 %v700_v23 }
  0x41   :  { %167 = vmatmul.bf16.gmra.mxu0 %v681_v24  ;;  %187 = vmatmul.bf16.gmra.mxu2 %v685_v26 }
  0x42   :  { %344 = vmatmul.bf16.gmra.mxu1 %v697_v25  ;;  %364 = vmatmul.bf16.gmra.mxu3 %v701_v27 }
  0x51   :  { %172 = vmatmul.bf16.gmra.mxu0 %v682_v28  ;;  %192 = vmatmul.bf16.gmra.mxu2 %v686_v30 }
  0x52   :  { %349 = vmatmul.bf16.gmra.mxu1 %v698_v29  ;;  %369 = vmatmul.bf16.gmra.mxu3 %v702_v31 }
  0x9e   :  { %v158_v32 = vpop.f32.mrf.mxu0 }
  0x9f   :  { %v335_v33 = vpop.f32.mrf.mxu1  ;;  %375 = vst [vmem:[%s1041_s4] sm:$0xff] %v158_v32  ;;  %v428_v56 = vmul.f32 %v158_v32, %v158_v32 }
  0xa0   :  { %391 = vst [vmem:[%s1042_s5] sm:$0xff] %v335_v33  ;;  %v494_v57 = vmul.f32 %v335_v33, %v335_v33 }
  0xa4   :  { %v869_v34 = vpop.f32.mrf.mxu2 }
  0xa5   :  { %v871_v35 = vpop.f32.mrf.mxu3  ;;  %383 = vst [vmem:[%s1041_s4 + $0x40] sm:$0xff] %v869_v34 }
  0xa6   :  { %v160_v36 = vpop.f32.mrf.mxu0  ;;  %399 = vst [vmem:[%s1042_s5 + $0x40] sm:$0xff] %v871_v35 }
  0xa7   :  { %v337_v37 = vpop.f32.mrf.mxu1  ;;  %376 = vst [vmem:[%s1041_s4 + $0x8] sm:$0xff] %v160_v36  ;;  %v429_v54 = vmul.f32 %v160_v36, %v160_v36  ;;  %v407_v60 = vadd.f32 %v160_v36, %v158_v32 }
  0xa8   :  { %392 = vst [vmem:[%s1042_s5 + $0x8] sm:$0xff] %v337_v37  ;;  %v495_v55 = vmul.f32 %v337_v37, %v337_v37  ;;  %v473_v61 = vadd.f32 %v337_v37, %v335_v33 }
  0xa9   :  { %v444_v62 = vadd.f32 %v429_v54, %v428_v56 }
  0xaa   :  { %v510_v63 = vadd.f32 %v495_v55, %v494_v57 }
  0xac   :  { %v887_v38 = vpop.f32.mrf.mxu2 }
  0xad   :  { %v889_v39 = vpop.f32.mrf.mxu3  ;;  %384 = vst [vmem:[%s1041_s4 + $0x48] sm:$0xff] %v887_v38  ;;  %v437_v56 = vmul.f32 %v887_v38, %v887_v38 }
  0xae   :  { %v163_v40 = vpop.f32.mrf.mxu0  ;;  %400 = vst [vmem:[%s1042_s5 + $0x48] sm:$0xff] %v889_v39  ;;  %v503_v57 = vmul.f32 %v889_v39, %v889_v39 }
  0xaf   :  { %v340_v41 = vpop.f32.mrf.mxu1  ;;  %377 = vst [vmem:[%s1041_s4 + $0x10] sm:$0xff] %v163_v40  ;;  %v430_v58 = vmul.f32 %v163_v40, %v163_v40  ;;  %v408_v2 = vadd.f32 %v407_v60, %v163_v40 }
  0xb0   :  { %393 = vst [vmem:[%s1042_s5 + $0x10] sm:$0xff] %v340_v41  ;;  %v496_v59 = vmul.f32 %v340_v41, %v340_v41  ;;  %v474_v3 = vadd.f32 %v473_v61, %v340_v41 }
  0xb1   :  { %v445_v6 = vadd.f32 %v444_v62, %v430_v58 }
  0xb2   :  { %v511_v7 = vadd.f32 %v510_v63, %v496_v59 }
  0xb4   :  { %v905_v42 = vpop.f32.mrf.mxu2 }
  0xb5   :  { %v907_v43 = vpop.f32.mrf.mxu3  ;;  %385 = vst [vmem:[%s1041_s4 + $0x50] sm:$0xff] %v905_v42 }
  0xb6   :  { %v165_v44 = vpop.f32.mrf.mxu0  ;;  %401 = vst [vmem:[%s1042_s5 + $0x50] sm:$0xff] %v907_v43  ;;  %v504_v61 = vmul.f32 %v907_v43, %v907_v43 }
  0xb7   :  { %v342_v45 = vpop.f32.mrf.mxu1  ;;  %378 = vst [vmem:[%s1041_s4 + $0x18] sm:$0xff] %v165_v44  ;;  %v431_v0 = vmul.f32 %v165_v44, %v165_v44  ;;  %v409_v12 = vadd.f32 %v408_v2, %v165_v44 }
  0xb8   :  { %394 = vst [vmem:[%s1042_s5 + $0x18] sm:$0xff] %v342_v45  ;;  %v497_v1 = vmul.f32 %v342_v45, %v342_v45  ;;  %v475_v13 = vadd.f32 %v474_v3, %v342_v45 }
  0xb9   :  { %v446_v14 = vadd.f32 %v445_v6, %v431_v0 }
  0xba   :  { %v512_v15 = vadd.f32 %v511_v7, %v497_v1 }
  0xbc   :  { %v923_v46 = vpop.f32.mrf.mxu2 }
  0xbd   :  { %v925_v47 = vpop.f32.mrf.mxu3  ;;  %386 = vst [vmem:[%s1041_s4 + $0x58] sm:$0xff] %v923_v46 }
  0xbe   :  { %v168_v48 = vpop.f32.mrf.mxu0  ;;  %402 = vst [vmem:[%s1042_s5 + $0x58] sm:$0xff] %v925_v47 }
  0xbf   :  { %v345_v49 = vpop.f32.mrf.mxu1  ;;  %379 = vst [vmem:[%s1041_s4 + $0x20] sm:$0xff] %v168_v48  ;;  %v432_v8 = vmul.f32 %v168_v48, %v168_v48  ;;  %v410_v18 = vadd.f32 %v409_v12, %v168_v48  ;;  %v436_v48 = vmul.f32 %v869_v34, %v869_v34 }
  0xc0   :  { %395 = vst [vmem:[%s1042_s5 + $0x20] sm:$0xff] %v345_v49  ;;  %v498_v9 = vmul.f32 %v345_v49, %v345_v49  ;;  %v476_v19 = vadd.f32 %v475_v13, %v345_v49  ;;  %v502_v49 = vmul.f32 %v871_v35, %v871_v35 }
  0xc1   :  { %v447_v20 = vadd.f32 %v446_v14, %v432_v8 }
  0xc2   :  { %v513_v21 = vadd.f32 %v512_v15, %v498_v9 }
  0xc4   :  { %v941_v50 = vpop.f32.mrf.mxu2 }
  0xc5   :  { %v943_v51 = vpop.f32.mrf.mxu3  ;;  %387 = vst [vmem:[%s1041_s4 + $0x60] sm:$0xff] %v941_v50 }
  0xc6   :  { %v170_v52 = vpop.f32.mrf.mxu0  ;;  %403 = vst [vmem:[%s1042_s5 + $0x60] sm:$0xff] %v943_v51  ;;  %v506_v9 = vmul.f32 %v943_v51, %v943_v51 }
  0xc7   :  { %v347_v53 = vpop.f32.mrf.mxu1  ;;  %380 = vst [vmem:[%s1041_s4 + $0x28] sm:$0xff] %v170_v52  ;;  %v433_v16 = vmul.f32 %v170_v52, %v170_v52  ;;  %v411_v24 = vadd.f32 %v410_v18, %v170_v52 }
  0xc8   :  { %396 = vst [vmem:[%s1042_s5 + $0x28] sm:$0xff] %v347_v53  ;;  %v499_v17 = vmul.f32 %v347_v53, %v347_v53  ;;  %v477_v25 = vadd.f32 %v476_v19, %v347_v53 }
  0xc9   :  { %v448_v26 = vadd.f32 %v447_v20, %v433_v16 }
  0xca   :  { %v514_v27 = vadd.f32 %v513_v21, %v499_v17 }
  0xcc   :  { %v959_v4 = vpop.f32.mrf.mxu2 }
  0xcd   :  { %v961_v5 = vpop.f32.mrf.mxu3  ;;  %388 = vst [vmem:[%s1041_s4 + $0x68] sm:$0xff] %v959_v4 }
  0xce   :  { %v173_v10 = vpop.f32.mrf.mxu0  ;;  %404 = vst [vmem:[%s1042_s5 + $0x68] sm:$0xff] %v961_v5 }
  0xcf   :  { %v350_v11 = vpop.f32.mrf.mxu1  ;;  %381 = vst [vmem:[%s1041_s4 + $0x30] sm:$0xff] %v173_v10  ;;  %v434_v22 = vmul.f32 %v173_v10, %v173_v10  ;;  %v412_v28 = vadd.f32 %v411_v24, %v173_v10 }
  0xd0   :  { %397 = vst [vmem:[%s1042_s5 + $0x30] sm:$0xff] %v350_v11  ;;  %v500_v23 = vmul.f32 %v350_v11, %v350_v11  ;;  %v478_v29 = vadd.f32 %v477_v25, %v350_v11 }
  0xd1   :  { %v449_v32 = vadd.f32 %v448_v26, %v434_v22 }
  0xd2   :  { %v515_v33 = vadd.f32 %v514_v27, %v500_v23 }
  0xd4   :  { %v193_v30 = vpop.f32.mrf.mxu2 }
  0xd5   :  { %v370_v31 = vpop.f32.mrf.mxu3  ;;  %389 = vst [vmem:[%s1041_s4 + $0x70] sm:$0xff] %v193_v30  ;;  %v442_v18 = vmul.f32 %v193_v30, %v193_v30 }
  0xd6   :  { %v175_v36 = vpop.f32.mrf.mxu0  ;;  %405 = vst [vmem:[%s1042_s5 + $0x70] sm:$0xff] %v370_v31  ;;  %v508_v19 = vmul.f32 %v370_v31, %v370_v31 }
  0xd7   :  { %v352_v37 = vpop.f32.mrf.mxu1  ;;  %382 = vst [vmem:[%s1041_s4 + $0x38] sm:$0xff] %v175_v36  ;;  %v413_v40 = vadd.f32 %v412_v28, %v175_v36  ;;  %v435_v41 = vmul.f32 %v175_v36, %v175_v36 }
  0xd8   :  { %v479_v44 = vadd.f32 %v478_v29, %v352_v37  ;;  %v501_v45 = vmul.f32 %v352_v37, %v352_v37  ;;  %398 = vst [vmem:[%s1042_s5 + $0x38] sm:$0xff] %v352_v37 }
  0xd9   :  { %v414_v52 = vadd.f32 %v413_v40, %v869_v34  ;;  %v450_v53 = vadd.f32 %v449_v32, %v435_v41  ;;  %v465_v40 = vlaneseq }
  0xda   :  { %v480_v54 = vadd.f32 %v479_v44, %v871_v35  ;;  %v516_v55 = vadd.f32 %v515_v33, %v501_v45  ;;  %v438_v35 = vmul.f32 %v905_v42, %v905_v42 }
  0xdb   :  { %v415_v58 = vadd.f32 %v414_v52, %v887_v38  ;;  %v451_v59 = vadd.f32 %v450_v53, %v436_v48  ;;  %v439_v38 = vmul.f32 %v923_v46, %v923_v46  ;;  %v466_v53 = vshrl.u32 %v465_v40, 7 }
  0xdc   :  { %v481_v60 = vadd.f32 %v480_v54, %v889_v39  ;;  %v517_v34 = vadd.f32 %v516_v55, %v502_v49  ;;  %v195_v2 = vpop.f32.mrf.mxu2  ;;  %v505_v39 = vmul.f32 %v925_v47, %v925_v47 }
  0xdd   :  { %v416_v62 = vadd.f32 %v415_v58, %v905_v42  ;;  %v452_v63 = vadd.f32 %v451_v59, %v437_v56  ;;  %v372_v3 = vpop.f32.mrf.mxu3  ;;  %390 = vst [vmem:[%s1041_s4 + $0x78] sm:$0xff] %v195_v2  ;;  %vm467_vm0 = vcmp.eq.s32.totalorder %v466_v53, 0  ;;  %vm469_vm1 = vcmp.eq.s32.totalorder %v466_v53, 1 }
  0xde   :  { %v482_v0 = vadd.f32 %v481_v60, %v907_v43  ;;  %v518_v1 = vadd.f32 %v517_v34, %v503_v57  ;;  %406 = vst [vmem:[%s1042_s5 + $0x78] sm:$0xff] %v372_v3  ;;  %v440_v43 = vmul.f32 %v941_v50, %v941_v50  ;;  %v509_v23 = vmul.f32 %v372_v3, %v372_v3 }
  0xdf   :  { %v453_v6 = vadd.f32 %v452_v63, %v438_v35  ;;  %v417_v7 = vadd.f32 %v416_v62, %v923_v46  ;;  %v441_v46 = vmul.f32 %v959_v4, %v959_v4 }
  0xe0   :  { %v519_v42 = vadd.f32 %v518_v1, %v504_v61  ;;  %v483_v8 = vadd.f32 %v482_v0, %v925_v47  ;;  %v507_v47 = vmul.f32 %v961_v5, %v961_v5 }
  0xe1   :  { %v418_v10 = vadd.f32 %v417_v7, %v941_v50  ;;  %v454_v11 = vadd.f32 %v453_v6, %v439_v38 }
  0xe2   :  { %v484_v12 = vadd.f32 %v483_v8, %v943_v51  ;;  %v520_v13 = vadd.f32 %v519_v42, %v505_v39  ;;  %v443_v51 = vmul.f32 %v195_v2, %v195_v2 }
  0xe3   :  { %v419_v14 = vadd.f32 %v418_v10, %v959_v4  ;;  %v455_v15 = vadd.f32 %v454_v11, %v440_v43 }
  0xe4   :  { %v485_v16 = vadd.f32 %v484_v12, %v961_v5  ;;  %v521_v17 = vadd.f32 %v520_v13, %v506_v9 }
  0xe5   :  { %v420_v20 = vadd.f32 %v419_v14, %v193_v30  ;;  %v456_v50 = vadd.f32 %v455_v15, %v441_v46 }
  0xe6   :  { %v486_v21 = vadd.f32 %v485_v16, %v370_v31  ;;  %v522_v22 = vadd.f32 %v521_v17, %v507_v47 }
  0xe7   :  { %v457_v24 = vadd.f32 %v456_v50, %v442_v18  ;;  %v421_v26 = vadd.f32 %v420_v20, %v195_v2 }
  0xe8   :  { %v523_v25 = vadd.f32 %v522_v22, %v508_v19  ;;  %v487_v27 = vadd.f32 %v486_v21, %v372_v3 }
  0xe9   :  { %v422_v28 = vrot.slane %v421_v26, 4  ;;  %v458_v29 = vadd.f32 %v457_v24, %v443_v51 }
  0xea   :  { %v488_v32 = vrot.slane %v487_v27, 4  ;;  %v524_v4 = vadd.f32 %v523_v25, %v509_v23 }
  0xeb   :  { %v423_v33 = vadd.f32 %v422_v28, %v421_v26  ;;  %v459_v36 = vrot.slane %v458_v29, 4 }
  0xec   :  { %v489_v5 = vadd.f32 %v488_v32, %v487_v27  ;;  %v525_v37 = vrot.slane %v524_v4, 4 }
  0xed   :  { %v424_v41 = vrot.slane %v423_v33, 2  ;;  %v460_v30 = vadd.f32 %v459_v36, %v458_v29 }
  0xee   :  { %v490_v44 = vrot.slane %v489_v5, 2  ;;  %v526_v31 = vadd.f32 %v525_v37, %v524_v4 }
  0xef   :  { %v425_v45 = vadd.f32 %v424_v41, %v423_v33  ;;  %v461_v48 = vrot.slane %v460_v30, 2 }
  0xf0   :  { %v491_v49 = vadd.f32 %v490_v44, %v489_v5  ;;  %v527_v52 = vrot.slane %v526_v31, 2 }
  0xf1   :  { %v426_v54 = vrot.slane %v425_v45, 1  ;;  %v462_v55 = vadd.f32 %v461_v48, %v460_v30 }
  0xf2   :  { %v492_v56 = vrot.slane %v491_v49, 1  ;;  %v528_v57 = vadd.f32 %v527_v52, %v526_v31 }
  0xf3   :  { %v427_v58 = vadd.f32 %v426_v54, %v425_v45  ;;  %v463_v59 = vrot.slane %v462_v55, 1 }
  0xf4   :  { %v493_v60 = vadd.f32 %v492_v56, %v491_v49  ;;  %v529_v34 = vrot.slane %v528_v57, 1 }
  0xf5   :  { %v464_v35 = vadd.f32 %v463_v59, %v462_v55  ;;  %v468_v62 = vsel %vm467_vm0, %v427_v58, 0.0 }
  0xf6   :  { %v530_v61 = vadd.f32 %v529_v34, %v528_v57  ;;  %v531_v0 = vsel %vm467_vm0, %v493_v60, 0.0 }
  0xf7   :  { %v470_v63 = vsel %vm469_vm1, %v464_v35, 0.0 }
  0xf8   :  { %v532_v1 = vsel %vm469_vm1, %v530_v61, 0.0  ;;  %v471_v2 = vadd.f32 %v470_v63, %v468_v62 }
  0xf9   :  { %v533_v3 = vadd.f32 %v532_v1, %v531_v0 }
  0xfa   :  { %472 = vst [vmem:[%s1043_s6] sm:$0xff] %v471_v2 }
  0xfb   :  { %534 = vst [vmem:[%s1044_s7] sm:$0xff] %v533_v3 }

</bundles_post_ra>
